<compile_context>
chip_gen: v5e
topology: v5e:2x2
jax: 0.10.0
libtpu: 0.0.40
codegen_flags: <defaults>
</compile_context>

<pallas_src>
import numpy as np
import jax
import jax.numpy as jnp
from jax.experimental import pallas as pl
from jax.experimental.pallas import tpu as pltpu


# ------------------------------------------------------------------ kernel ---
def language_encoder_kernel(x_ref, wc_ref, bc_ref, wl_ref, bl_ref,
                            w1_ref, b1_ref, w2_ref, b2_ref, out_ref):
    # x is already bf16 (cast once in the wrapper); accum / bias / ReLU in fp32.
    # conv (folded to dense) + ReLU   : (B,16) @ (16,64) -> (B,64)
    h = jnp.dot(x_ref[...], wc_ref[...], preferred_element_type=jnp.float32)
    h = jnp.maximum(h + bc_ref[...], 0.0)
    # latent Linear(64,16) + ReLU     : (B,64) @ (64,16) -> (B,16)
    h = jnp.dot(h.astype(jnp.bfloat16), wl_ref[...], preferred_element_type=jnp.float32)
    h = jnp.maximum(h + bl_ref[...], 0.0)
    # fc_language Linear(16,768) + ReLU
    h = jnp.dot(h.astype(jnp.bfloat16), w1_ref[...], preferred_element_type=jnp.float32)
    h = jnp.maximum(h + b1_ref[...], 0.0)
    # fc_language2 Linear(768,768)
    out_ref[...] = (jnp.dot(h.astype(jnp.bfloat16), w2_ref[...],
                            preferred_element_type=jnp.float32) + b2_ref[...])


# ------------------------------------------------------------- param setup ---
def init_params(key):
    """Deterministic synthetic parameters matching the module's shapes."""
    ks = jax.random.split(key, 8)
    p = {}
    p["conv_w"] = jax.random.normal(ks[0], (16, 1, 3, 3), jnp.float32) * 0.2   # OIHW
    p["conv_b"] = jax.random.normal(ks[1], (16,), jnp.float32) * 0.1
    p["lat_w"]  = jax.random.normal(ks[2], (16, 64), jnp.float32) * 0.1        # (out, in)
    p["lat_b"]  = jax.random.normal(ks[3], (16,), jnp.float32) * 0.1
    p["fc1_w"]  = jax.random.normal(ks[4], (768, 16), jnp.float32) * 0.1
    p["fc1_b"]  = jax.random.normal(ks[5], (768,), jnp.float32) * 0.1
    p["fc2_w"]  = jax.random.normal(ks[6], (768, 768), jnp.float32) * 0.05
    p["fc2_b"]  = jax.random.normal(ks[7], (768,), jnp.float32) * 0.05
    return p


def fold_conv_to_dense(conv_w, conv_b):
    """Fold Conv2d(1,16,k=3,p=0) on a 4x4 input + NCHW Flatten into (16->64) dense.

    Output feature index = c*4 + oh*2 + ow       (torch Flatten order: C, H, W)
    Input pixel index    = (oh+kh)*4 + (ow+kw)   (row-major 4x4 image)
    """
    cw = np.asarray(conv_w)   # (16,1,3,3)
    cb = np.asarray(conv_b)   # (16,)
    w_eff = np.zeros((16, 64), dtype=np.float32)   # (in_pixels, out_features)
    b_eff = np.zeros((64,), dtype=np.float32)
    for c in range(16):
        for oh in range(2):
            for ow in range(2):
                out_idx = c * 4 + oh * 2 + ow
                b_eff[out_idx] = cb[c]
                for kh in range(3):
                    for kw in range(3):
                        in_idx = (oh + kh) * 4 + (ow + kw)
                        w_eff[in_idx, out_idx] += cw[c, 0, kh, kw]
    return w_eff, b_eff


def prepare_params(params):
    """One-time prep (outside the hot path): fold conv, transpose, cast to bf16."""
    w_conv_eff, b_conv_eff = fold_conv_to_dense(params["conv_w"], params["conv_b"])
    return (
        jnp.asarray(w_conv_eff).astype(jnp.bfloat16),                       # (16, 64)
        jnp.asarray(b_conv_eff, jnp.float32).reshape(1, 64),
        jnp.transpose(params["lat_w"]).astype(jnp.bfloat16),                # (64, 16)
        params["lat_b"].astype(jnp.float32).reshape(1, 16),
        jnp.transpose(params["fc1_w"]).astype(jnp.bfloat16),                # (16, 768)
        params["fc1_b"].astype(jnp.float32).reshape(1, 768),
        jnp.transpose(params["fc2_w"]).astype(jnp.bfloat16),                # (768, 768)
        params["fc2_b"].astype(jnp.float32).reshape(1, 768),
    )


# ---------------------------------------------------------------- wrapper ---
def language_encoder_forward(x, prep):
    wc, bc, wl, bl, w1, b1, w2, b2 = prep
    # == x.reshape(-1,1,4,4) flattened; bf16 cast hoisted out of the kernel.
    x2 = x.reshape(-1, 16).astype(jnp.bfloat16)
    B = x2.shape[0]
    n_out = w2.shape[1]                            # 768

    args = (x2, wc, bc, wl, bl, w1, b1, w2, b2)

    # Single block, everything VMEM-resident: no grid, no per-step overhead,
    # no recompute of the front chain.
    vmem_spec = pl.BlockSpec(memory_space=pltpu.MemorySpace.VMEM)

    flops = 2 * B * (16 * 64 + 64 * 16 + 16 * 768 + 768 * n_out)
    bytes_accessed = int(sum(a.size * a.dtype.itemsize for a in args)) + B * n_out * 4

    return pl.pallas_call(
        language_encoder_kernel,
        out_shape=jax.ShapeDtypeStruct((B, n_out), jnp.float32),
        in_specs=[vmem_spec] * len(args),
        out_specs=vmem_spec,
        cost_estimate=pl.CostEstimate(
            flops=flops, transcendentals=0, bytes_accessed=bytes_accessed),
    )(*args)


# -------------------------------------------------------------- references ---
def reference_forward(x, p):
    """fp32 reference that mirrors the PyTorch module exactly."""
    xi = x.reshape(-1, 1, 4, 4).astype(jnp.float32)
    y = jax.lax.conv_general_dilated(
        xi, p["conv_w"], window_strides=(1, 1), padding="VALID",
        dimension_numbers=("NCHW", "OIHW", "NCHW"))
    y = jnp.maximum(y + p["conv_b"][None, :, None, None], 0.0)
    y = y.reshape(y.shape[0], -1)                                   # (B, 64), C-major
    h = jnp.maximum(y @ p["lat_w"].T + p["lat_b"], 0.0)             # (B, 16)
    h = jnp.maximum(h @ p["fc1_w"].T + p["fc1_b"], 0.0)             # (B, 768)
    return h @ p["fc2_w"].T + p["fc2_b"]                            # (B, 768)


def bf16_reference_forward(x, prep):
    """Reference using the same bf16 operands / fp32 accumulation as the kernel."""
    wc, bc, wl, bl, w1, b1, w2, b2 = prep
    h = jnp.dot(x.reshape(-1, 16).astype(jnp.bfloat16), wc,
                preferred_element_type=jnp.float32)
    h = jnp.maximum(h + bc, 0.0)
    h = jnp.dot(h.astype(jnp.bfloat16), wl, preferred_element_type=jnp.float32)
    h = jnp.maximum(h + bl, 0.0)
    h = jnp.dot(h.astype(jnp.bfloat16), w1, preferred_element_type=jnp.float32)
    h = jnp.maximum(h + b1, 0.0)
    return jnp.dot(h.astype(jnp.bfloat16), w2, preferred_element_type=jnp.float32) + b2


# ------------------------------------------------------------------- main ---
if __name__ == "__main__":
    key = jax.random.PRNGKey(0)
    k_p, k_x = jax.random.split(key)

    params = init_params(k_p)
    prep = prepare_params(params)                       # one-time, outside hot path
    x = jax.random.normal(k_x, (8, 16), jnp.float32)    # B=8 images of 1x4x4

    fwd = jax.jit(language_encoder_forward)
    out = jax.block_until_ready(fwd(x, prep))

    assert out.shape == (8, 768), out.shape

    # Tight check against a reference using identical bf16 operands (kernel math).
    ref_bf = bf16_reference_forward(x, prep)
    assert jnp.allclose(out, ref_bf, atol=1e-3, rtol=1e-3), \
        float(jnp.max(jnp.abs(out - ref_bf)))

    # Looser check against the exact fp32 PyTorch-equivalent module (bf16 weights).
    ref32 = reference_forward(x, params)
    assert jnp.allclose(out, ref32, atol=2e-2, rtol=2e-2), \
        float(jnp.max(jnp.abs(out - ref32)))

    print("KERNEL_OK")
</pallas_src>

<mosaic_0001>
module attributes {stable_mosaic.version = 11 : i64} {
  func.func @language_encoder_kernel(%arg0: memref<8x16xbf16, #tpu.memory_space<vmem>>, %arg1: memref<16x64xbf16, #tpu.memory_space<vmem>>, %arg2: memref<1x64xf32, #tpu.memory_space<vmem>>, %arg3: memref<64x16xbf16, #tpu.memory_space<vmem>>, %arg4: memref<1x16xf32, #tpu.memory_space<vmem>>, %arg5: memref<16x768xbf16, #tpu.memory_space<vmem>>, %arg6: memref<1x768xf32, #tpu.memory_space<vmem>>, %arg7: memref<768x768xbf16, #tpu.memory_space<vmem>>, %arg8: memref<1x768xf32, #tpu.memory_space<vmem>>, %arg9: memref<8x768xf32, #tpu.memory_space<vmem>>) attributes {dimension_semantics = [], scalar_prefetch = 0 : i64, scratch_operands = 0 : i64, tpu.core_type = #tpu.core_type<tc>} {
    %c0 = arith.constant 0 : index
    %c0_0 = arith.constant 0 : index
    %0 = vector.load %arg0[%c0, %c0_0] : memref<8x16xbf16, #tpu.memory_space<vmem>>, vector<8x16xbf16>
    %c0_1 = arith.constant 0 : index
    %c0_2 = arith.constant 0 : index
    %1 = vector.load %arg1[%c0_1, %c0_2] : memref<16x64xbf16, #tpu.memory_space<vmem>>, vector<16x64xbf16>
    %cst = arith.constant dense<0.000000e+00> : vector<8x64xf32>
    %2 = tpu.matmul %0, %1, %cst {dimension_numbers = #tpu.dot_dimension_numbers<[1], [0], [0], [1], [0, 0, 1, 1], [], []>} : vector<8x16xbf16>, vector<16x64xbf16>, vector<8x64xf32> -> vector<8x64xf32>
    %c0_3 = arith.constant 0 : index
    %c0_4 = arith.constant 0 : index
    %3 = vector.load %arg2[%c0_3, %c0_4] : memref<1x64xf32, #tpu.memory_space<vmem>>, vector<1x64xf32>
    %4 = vector.broadcast %3 : vector<1x64xf32> to vector<8x64xf32>
    %5 = arith.addf %2, %4 : vector<8x64xf32>
    %cst_5 = arith.constant 0.000000e+00 : f32
    %6 = vector.broadcast %cst_5 : f32 to vector<8x64xf32>
    %7 = arith.maximumf %5, %6 : vector<8x64xf32>
    %8 = arith.truncf %7 : vector<8x64xf32> to vector<8x64xbf16>
    %c0_6 = arith.constant 0 : index
    %c0_7 = arith.constant 0 : index
    %9 = vector.load %arg3[%c0_6, %c0_7] : memref<64x16xbf16, #tpu.memory_space<vmem>>, vector<64x16xbf16>
    %cst_8 = arith.constant dense<0.000000e+00> : vector<8x16xf32>
    %10 = tpu.matmul %8, %9, %cst_8 {dimension_numbers = #tpu.dot_dimension_numbers<[1], [0], [0], [1], [0, 0, 1, 1], [], []>} : vector<8x64xbf16>, vector<64x16xbf16>, vector<8x16xf32> -> vector<8x16xf32>
    %c0_9 = arith.constant 0 : index
    %c0_10 = arith.constant 0 : index
    %11 = vector.load %arg4[%c0_9, %c0_10] : memref<1x16xf32, #tpu.memory_space<vmem>>, vector<1x16xf32>
    %12 = vector.broadcast %11 : vector<1x16xf32> to vector<8x16xf32>
    %13 = arith.addf %10, %12 : vector<8x16xf32>
    %cst_11 = arith.constant 0.000000e+00 : f32
    %14 = vector.broadcast %cst_11 : f32 to vector<8x16xf32>
    %15 = arith.maximumf %13, %14 : vector<8x16xf32>
    %16 = arith.truncf %15 : vector<8x16xf32> to vector<8x16xbf16>
    %c0_12 = arith.constant 0 : index
    %c0_13 = arith.constant 0 : index
    %17 = vector.load %arg5[%c0_12, %c0_13] : memref<16x768xbf16, #tpu.memory_space<vmem>>, vector<16x768xbf16>
    %cst_14 = arith.constant dense<0.000000e+00> : vector<8x768xf32>
    %18 = tpu.matmul %16, %17, %cst_14 {dimension_numbers = #tpu.dot_dimension_numbers<[1], [0], [0], [1], [0, 0, 1, 1], [], []>} : vector<8x16xbf16>, vector<16x768xbf16>, vector<8x768xf32> -> vector<8x768xf32>
    %c0_15 = arith.constant 0 : index
    %c0_16 = arith.constant 0 : index
    %19 = vector.load %arg6[%c0_15, %c0_16] : memref<1x768xf32, #tpu.memory_space<vmem>>, vector<1x768xf32>
    %20 = vector.broadcast %19 : vector<1x768xf32> to vector<8x768xf32>
    %21 = arith.addf %18, %20 : vector<8x768xf32>
    %cst_17 = arith.constant 0.000000e+00 : f32
    %22 = vector.broadcast %cst_17 : f32 to vector<8x768xf32>
    %23 = arith.maximumf %21, %22 : vector<8x768xf32>
    %24 = arith.truncf %23 : vector<8x768xf32> to vector<8x768xbf16>
    %c0_18 = arith.constant 0 : index
    %c0_19 = arith.constant 0 : index
    %25 = vector.load %arg7[%c0_18, %c0_19] : memref<768x768xbf16, #tpu.memory_space<vmem>>, vector<768x768xbf16>
    %cst_20 = arith.constant dense<0.000000e+00> : vector<8x768xf32>
    %26 = tpu.matmul %24, %25, %cst_20 {dimension_numbers = #tpu.dot_dimension_numbers<[1], [0], [0], [1], [0, 0, 1, 1], [], []>} : vector<8x768xbf16>, vector<768x768xbf16>, vector<8x768xf32> -> vector<8x768xf32>
    %c0_21 = arith.constant 0 : index
    %c0_22 = arith.constant 0 : index
    %27 = vector.load %arg8[%c0_21, %c0_22] : memref<1x768xf32, #tpu.memory_space<vmem>>, vector<1x768xf32>
    %28 = vector.broadcast %27 : vector<1x768xf32> to vector<8x768xf32>
    %29 = arith.addf %26, %28 : vector<8x768xf32>
    %c0_23 = arith.constant 0 : index
    %c0_24 = arith.constant 0 : index
    %30 = vector.load %arg9[%c0_23, %c0_24] : memref<8x768xf32, #tpu.memory_space<vmem>>, vector<8x768xf32>
    tpu.vector_store %arg9[%c0_23, %c0_24], %29 {strides = array<i32>} : memref<8x768xf32, #tpu.memory_space<vmem>>, vector<8x768xf32>,
    return
  }
}

</mosaic_0001>

<bundles_post_ra>
// kernel: language_encoder_forward.1
= control target key start
LH: loop header
LB: loop body
LE: loop exit
PB: predicated region body
PF: predicated region fallthrough
CT: control target
= control target key end

     0   :  { %14 = vsyncpa [#allocation3], 0  ;;  %s4518_s0 = inlined_call_operand.vmem [shape: bf16[8,16], index: 0, kind: input, shape index: {}]   ;;  %s4519_s1 = inlined_call_operand.hbm [shape: bf16[16,64], index: 1, kind: input, shape index: {}]   ;;  %s4520_s2 = inlined_call_operand.hbm [shape: f32[1,64], index: 2, kind: input, shape index: {}]   ;;  %s4521_s3 = inlined_call_operand.vmem [shape: bf16[64,16], index: 3, kind: input, shape index: {}]   ;;  %s4522_s4 = inlined_call_operand.hbm [shape: f32[1,16], index: 4, kind: input, shape index: {}]   ;;  %s4523_s5 = inlined_call_operand.hbm [shape: bf16[16,768], index: 5, kind: input, shape index: {}]   ;;  %s4524_s6 = inlined_call_operand.hbm [shape: f32[1,768], index: 6, kind: input, shape index: {}]   ;;  %s4525_s7 = inlined_call_operand.hbm [shape: bf16[768,768], index: 7, kind: input, shape index: {}]   ;;  %s4526_s8 = inlined_call_operand.hbm [shape: f32[1,768], index: 8, kind: input, shape index: {}]   ;;  %s4527_s9 = inlined_call_operand.hbm [shape: f32[8,768], index: 9, kind: output, shape index: {}]  }
   0x1   :  { %15 = vsyncpa [#allocation6], 0 }
   0x2   :  { %16 = vsyncpa [#allocation9], 0 }
   0x3   :  { %17 = vsyncpa [#allocation12], 0  ;;  %s39_s11 = sshll.u32 %s4520_s2, 4  ;;  %s40_s11 = int_to_ptr.hbm [resolvable:$true] %s39_s11 }
   0x4   :  { %18 = vsyncpa [#allocation4], 0  ;;  %s4320_s12 = smov [#allocation5]   ;;  %s62_s16 = sshll.u32 %s4523_s5, 4  ;;  %s63_s16 = int_to_ptr.hbm [resolvable:$true] %s62_s16 }
   0x5   :  { %s41_s13 = sshll.u32 %s4320_s12, 4  ;;  %s4321_s17 = smov [#allocation8]   ;;  %s42_s13 = int_to_ptr.vmem [resolvable:$true] %s41_s13 }
   0x6   :  { %44 = dma.hbm_to_vmem [thread:$0]  %s40_s11, 16, %s42_s13, [#allocation6]  }
   0x7   :  { %s64_s18 = sshll.u32 %s4321_s17, 4  ;;  %s4322_s19 = smov 384   ;;  %s65_s18 = int_to_ptr.vmem [resolvable:$true] %s64_s18 }
   0x8   :  { %s4323_s20 = smov 24   ;;  %s86_s2 = sshll.u32 %s4525_s7, 4  ;;  %s87_s2 = int_to_ptr.hbm [resolvable:$true] %s86_s2 }
   0x9   :  { %70 = dma.hbm_to_vmem [thread:$0]  %s63_s16, 768, %s65_s18, [#allocation9], %s4322_s19, %s4322_s19, %s4323_s20  }
   0xa   :  { %s4324_s23 = smov [#allocation11]   ;;  %s25_s5 = sshll.u32 %s4519_s1, 4  ;;  %s26_s5 = int_to_ptr.hbm [resolvable:$true] %s25_s5 }
   0xb   :  { %s88_s24 = sshll.u32 %s4324_s23, 4  ;;  %s4325_s27 = smov [#allocation2]   ;;  %s89_s24 = int_to_ptr.vmem [resolvable:$true] %s88_s24 }
   0xc   :  { %94 = dma.hbm_to_vmem [thread:$0]  %s87_s2, 36864, %s89_s24, [#allocation12], %s4322_s19, %s4322_s19, %s4323_s20  }
   0xd   :  { %s27_s28 = sshll.u32 %s4325_s27, 4  ;;  %s4326_s29 = smov 64   ;;  %s28_s28 = int_to_ptr.vmem [resolvable:$true] %s27_s28 }
   0xe   :  { %s4327_s30 = smov 4   ;;  %s52_s7 = sshll.u32 %s4522_s4, 4  ;;  %s53_s7 = int_to_ptr.hbm [resolvable:$true] %s52_s7 }
   0xf   :  { %33 = dma.hbm_to_vmem [thread:$0]  %s26_s5, 128, %s28_s28, [#allocation3], %s4326_s29, %s4326_s29, %s4327_s30  }
  0x10   :  { %s4328_s12 = smov [#allocation7]   ;;  %s76_s1 = sshll.u32 %s4524_s6, 4  ;;  %s77_s1 = int_to_ptr.hbm [resolvable:$true] %s76_s1 }
  0x11   :  { %s54_s13 = sshll.u32 %s4328_s12, 4  ;;  %s4329_s16 = smov [#allocation10]   ;;  %s55_s13 = int_to_ptr.vmem [resolvable:$true] %s54_s13 }
  0x12   :  { %57 = dma.hbm_to_vmem [thread:$0]  %s53_s7, 16, %s55_s13, [#allocation6]  }
  0x13   :  { %s78_s17 = sshll.u32 %s4329_s16, 4  ;;  %s100_s20 = sshll.u32 %s4526_s8, 4  ;;  %s79_s17 = int_to_ptr.vmem [resolvable:$true] %s78_s17  ;;  %s101_s20 = int_to_ptr.hbm [resolvable:$true] %s100_s20 }
  0x14   :  { %81 = dma.hbm_to_vmem [thread:$0]  %s77_s1, 96, %s79_s17, [#allocation9]  }
  0x15   :  { %s4330_s4 = smov [#allocation13]  }
  0x16   :  { %s102_s21 = sshll.u32 %s4330_s4, 4  ;;  %s103_s21 = int_to_ptr.vmem [resolvable:$true] %s102_s21 }
  0x17   :  { %105 = dma.hbm_to_vmem [thread:$0]  %s101_s20, 96, %s103_s21, [#allocation12]  }
  0x18   :  { %4310 = dma.done.wait [#allocation3], 128  }
  0x19   :  { %4311 = vsyncadd [#allocation3], 4294967168 }
  0x1a   :  { %4312 = dma.done.wait [#allocation6], 32  }
  0x1b   :  { %4313 = vsyncadd [#allocation6], 4294967264 }
  0x1c   :  { %4314 = dma.done.wait [#allocation9], 864  }
  0x1d   :  { %4315 = vsyncadd [#allocation9], 4294966432 }
  0x1e   :  { %4316 = dma.done.wait [#allocation12], 36960  }
  0x1f   :  { %4317 = vsyncadd [#allocation12], 4294930336  ;;  %v3805_v0 = vld [vmem:[#allocation2] sm:$0xff]  ;;  %v3809_v1 = vld [vmem:[%s4521_s3 + $0x18] sm:$0xff]  ;;  %vm148_vm0 = vcmask 130048   ;;  %vm203_vm1 = vcmask 523264  }
  0x20   :  { %159 = vmatpush.bf16.msra.mxu0 %v3805_v0  ;;  %v135_v2 = vld [vmem:[%s4518_s0] sm:$0xf]  ;;  %211 = vmatpush.bf16.msra.mxu1 %v3809_v1  ;;  %v3808_v3 = vld [vmem:[%s4521_s3 + $0x10] sm:$0xff]  ;;  %v3807_v4 = vld [vmem:[%s4521_s3 + $0x8] sm:$0xff]  ;;  %s4331_s0 = smov [#allocation14]   ;;  %s2588_s30 = sshll.u32 %s4527_s9, 4  ;;  %s2589_s30 = int_to_ptr.hbm [resolvable:$true] %s2588_s30 }
  0x21   :  { %v3806_v5 = vld [vmem:[%s4521_s3] sm:$0xff]  ;;  %v4116_v6 = vld [vmem:[#allocation5] ss:$0 sm:$0xff]  ;;  %v2625_v12 = vld [vmem:[#allocation8] sm:$0xf]  ;;  %s2586_s3 = sshll.u32 %s4331_s0, 4  ;;  %s2587_s3 = int_to_ptr.vmem [resolvable:$true] %s2586_s3 }
  0x22   :  { %v3813_v13 = vld [vmem:[#allocation8 + $0x14] sm:$0xf0]  ;;  %v3810_v14 = vld [vmem:[#allocation8 + $0x4] sm:$0xf]  ;;  %v2627_v16 = vld [vmem:[#allocation8 + $0x18] sm:$0xf0] }
  0x23   :  { %2605 = vmatmul.msk.bf16.vlgmr.msra.gmra.mxu0 %vm148_vm0, %v135_v2  ;;  %v2626_v15 = vor.u32 %v3813_v13, %v2625_v12  ;;  %v2633_v17 = vld [vmem:[#allocation8 + $0x8] sm:$0xf]  ;;  %v3814_v18 = vld [vmem:[#allocation8 + $0x1c] sm:$0xf0]  ;;  %v2630_v19 = vor.u32 %v3810_v14, %v2627_v16  ;;  %v3812_v21 = vld [vmem:[#allocation8 + $0x14] sm:$0xf] }
  0x24   :  { %212 = vmatpush.bf16.msra.mxu1 %v3808_v3  ;;  %v2634_v20 = vor.u32 %v3814_v18, %v2633_v17  ;;  %v2643_v22 = vld [vmem:[#allocation8 + $0x28] sm:$0xf0]  ;;  %v2635_v25 = vld [vmem:[#allocation8 + $0x20] sm:$0xf0]  ;;  %v2641_v26 = vld [vmem:[#allocation8 + $0x10] sm:$0xf] }
  0x25   :  { %282 = vmatpush.bf16.msra.mxu2 %v2626_v15  ;;  %v2646_v23 = vor.u32 %v3812_v21, %v2643_v22  ;;  %295 = vmatpush.bf16.msra.mxu3 %v2630_v19  ;;  %v3811_v24 = vld [vmem:[#allocation8 + $0xc] sm:$0xf]  ;;  %v3815_v28 = vld [vmem:[#allocation8 + $0x24] sm:$0xf0]  ;;  %v3861_v31 = vld [vmem:[#allocation11 + $0x164] sm:$0xf0] }
  0x26   :  { %308 = vmatpush.bf16.msrb.mxu0 %v2634_v20  ;;  %v2638_v27 = vor.u32 %v3811_v24, %v2635_v25  ;;  %v2642_v29 = vor.u32 %v3815_v28, %v2641_v26  ;;  %v2823_v30 = vld [vmem:[#allocation11 + $0x150] sm:$0xf]  ;;  %v2799_v33 = vld [vmem:[#allocation11 + $0x120] sm:$0xf]  ;;  %v3855_v34 = vld [vmem:[#allocation11 + $0x134] sm:$0xf0] }
  0x27   :  { %v2824_v32 = vor.u32 %v3861_v31, %v2823_v30  ;;  %v2800_v35 = vor.u32 %v3855_v34, %v2799_v33  ;;  %v2775_v36 = vld [vmem:[#allocation11 + $0xf0] sm:$0xf]  ;;  %v3849_v37 = vld [vmem:[#allocation11 + $0x104] sm:$0xf0]  ;;  %v2751_v49 = vld [vmem:[#allocation11 + $0xc0] sm:$0xf] }
  0x28   :  { %213 = vmatpush.bf16.msra.mxu1 %v3807_v4  ;;  %v4117_v38 = vld [vmem:[#allocation7] ss:$0 sm:$0xff]  ;;  %v2776_v39 = vor.u32 %v3849_v37, %v2775_v36  ;;  %v3207_v42 = vld [vmem:[#allocation11 + $0x450] sm:$0xf]  ;;  %v3843_v50 = vld [vmem:[#allocation11 + $0xd4] sm:$0xf0] }
  0x29   :  { %321 = vmatpush.bf16.msrb.mxu2 %v2638_v27  ;;  %334 = vmatpush.bf16.msrb.mxu3 %v2642_v29  ;;  %v3957_v43 = vld [vmem:[#allocation11 + $0x464] sm:$0xf0]  ;;  %v3399_v44 = vld [vmem:[#allocation11 + $0x5d0] sm:$0xf]  ;;  %v3375_v52 = vld [vmem:[#allocation11 + $0x5a0] sm:$0xf]  ;;  %v2752_v61 = vor.u32 %v3843_v50, %v2751_v49 }
  0x2a   :  { %2107 = vmatpush.bf16.msra.mxu0 %v2824_v32  ;;  %v3015_v45 = vld [vmem:[#allocation11 + $0x2d0] sm:$0xf]  ;;  %v3909_v46 = vld [vmem:[#allocation11 + $0x2e4] sm:$0xf0]  ;;  %v3208_v54 = vor.u32 %v3957_v43, %v3207_v42  ;;  %v3183_v55 = vld [vmem:[#allocation11 + $0x420] sm:$0xf] }
  0x2b   :  { %v4005_v47 = vld [vmem:[#allocation11 + $0x5e4] sm:$0xf0]  ;;  %v3016_v56 = vor.u32 %v3909_v46, %v3015_v45  ;;  %v3999_v57 = vld [vmem:[#allocation11 + $0x5b4] sm:$0xf0]  ;;  %v2991_v59 = vld [vmem:[#allocation11 + $0x2a0] sm:$0xf] }
  0x2c   :  { %214 = vmatpush.bf16.msra.mxu1 %v3806_v5  ;;  %v3400_v51 = vor.u32 %v4005_v47, %v3399_v44  ;;  %v3951_v58 = vld [vmem:[#allocation11 + $0x434] sm:$0xf0]  ;;  %v3376_v62 = vor.u32 %v3999_v57, %v3375_v52  ;;  %v2727_v63 = vld [vmem:[#allocation11 + $0x90] sm:$0xf]  ;;  %v3837_v0 = vld [vmem:[#allocation11 + $0xa4] sm:$0xf0] }
  0x2d   :  { %v3903_v60 = vld [vmem:[#allocation11 + $0x2b4] sm:$0xf0]  ;;  %v3351_v2 = vld [vmem:[#allocation11 + $0x570] sm:$0xf]  ;;  %v3993_v3 = vld [vmem:[#allocation11 + $0x584] sm:$0xf0]  ;;  %v3184_v4 = vor.u32 %v3951_v58, %v3183_v55 }
  0x2e   :  { %2108 = vmatpush.bf16.msra.mxu0 %v2800_v35  ;;  %v3159_v5 = vld [vmem:[#allocation11 + $0x3f0] sm:$0xf]  ;;  %v3352_v12 = vor.u32 %v3993_v3, %v3351_v2  ;;  %v3831_v13 = vld [vmem:[#allocation11 + $0x74] sm:$0xf0]  ;;  %v3327_v14 = vld [vmem:[#allocation11 + $0x540] sm:$0xf] }
  0x2f   :  { %v3987_v15 = vld [vmem:[#allocation11 + $0x554] sm:$0xf0]  ;;  %v3135_v17 = vld [vmem:[#allocation11 + $0x3c0] sm:$0xf]  ;;  %v3825_v25 = vld [vmem:[#allocation11 + $0x44] sm:$0xf0] }
  0x30   :  { %347 = vmatpush.bf16.msrb.mxu1 %v2646_v23  ;;  %v3939_v18 = vld [vmem:[#allocation11 + $0x3d4] sm:$0xf0]  ;;  %v2943_v20 = vld [vmem:[#allocation11 + $0x240] sm:$0xf]  ;;  %v2679_v23 = vld [vmem:[#allocation11 + $0x30] sm:$0xf]  ;;  %v3328_v24 = vor.u32 %v3987_v15, %v3327_v14 }
  0x31   :  { %v3891_v21 = vld [vmem:[#allocation11 + $0x254] sm:$0xf0]  ;;  %v3303_v26 = vld [vmem:[#allocation11 + $0x510] sm:$0xf]  ;;  %v3981_v27 = vld [vmem:[#allocation11 + $0x524] sm:$0xf0]  ;;  %v3136_v28 = vor.u32 %v3939_v18, %v3135_v17  ;;  %v2680_v34 = vor.u32 %v3825_v25, %v2679_v23 }
  0x32   :  { %2109 = vmatpush.bf16.msra.mxu0 %v2776_v39  ;;  %v3111_v29 = vld [vmem:[#allocation11 + $0x390] sm:$0xf]  ;;  %v3933_v30 = vld [vmem:[#allocation11 + $0x3a4] sm:$0xf0]  ;;  %v2944_v31 = vor.u32 %v3891_v21, %v2943_v20  ;;  %v2655_v35 = vld [vmem:[#allocation11] sm:$0xf]  ;;  %v3304_v36 = vor.u32 %v3981_v27, %v3303_v26 }
  0x33   :  { %v2919_v32 = vld [vmem:[#allocation11 + $0x210] sm:$0xf]  ;;  %v3885_v33 = vld [vmem:[#allocation11 + $0x224] sm:$0xf0]  ;;  %v3819_v37 = vld [vmem:[#allocation11 + $0x14] sm:$0xf0]  ;;  %v3112_v42 = vor.u32 %v3933_v30, %v3111_v29 }
  0x34   :  { %v3975_v39 = vld [vmem:[#allocation11 + $0x4f4] sm:$0xf0]  ;;  %v3087_v43 = vld [vmem:[#allocation11 + $0x360] sm:$0xf]  ;;  %v2920_v44 = vor.u32 %v3885_v33, %v2919_v32  ;;  %v3969_v52 = vld [vmem:[#allocation11 + $0x4c4] sm:$0xf0] }
  0x35   :  { %v3927_v45 = vld [vmem:[#allocation11 + $0x374] sm:$0xf0]  ;;  %v2895_v46 = vld [vmem:[#allocation11 + $0x1e0] sm:$0xf]  ;;  %v3063_v57 = vld [vmem:[#allocation11 + $0x330] sm:$0xf] }
  0x36   :  { %2110 = vmatpush.bf16.msra.mxu0 %v2752_v61  ;;  %v3879_v47 = vld [vmem:[#allocation11 + $0x1f4] sm:$0xf0]  ;;  %v3873_v61 = vld [vmem:[#allocation11 + $0x1c4] sm:$0xf0]  ;;  %v3519_v15 = vld [vmem:[#allocation11 + $0x6c0] sm:$0xf] }
  0x37   :  { %v4047_v55 = vld [vmem:[#allocation11 + $0x734] sm:$0xf0]  ;;  %v2896_v58 = vor.u32 %v3879_v47, %v2895_v46  ;;  %v4041_v2 = vld [vmem:[#allocation11 + $0x704] sm:$0xf0]  ;;  %v3852_v20 = vld [vmem:[#allocation11 + $0x124] sm:$0xf] }
  0x38   :  { %v3759_v23 = vld [vmem:[#allocation11 + $0x8a0] sm:$0xf]  ;;  %v3846_v27 = vld [vmem:[#allocation11 + $0xf4] sm:$0xf]  ;;  %v2777_v29 = vld [vmem:[#allocation11 + $0x108] sm:$0xf0] }
  0x39   :  { %v3735_v30 = vld [vmem:[#allocation11 + $0x870] sm:$0xf]  ;;  %v2780_v32 = vor.u32 %v3846_v27, %v2777_v29  ;;  %v3840_v33 = vld [vmem:[#allocation11 + $0xc4] sm:$0xf]  ;;  %v4029_v47 = vld [vmem:[#allocation11 + $0x6a4] sm:$0xf0] }
  0x3a   :  { %v3495_v46 = vld [vmem:[#allocation11 + $0x690] sm:$0xf]  ;;  %v3876_v27 = vld [vmem:[#allocation11 + $0x1e4] sm:$0xf] }
  0xa0   :  { %v161_v7 = vpop.f32.mrf.mxu0 }
  0xa1   :  { %v162_v8 = vadd.f32 %v4116_v6, %v161_v7  ;;  %v3945_v6 = vld [vmem:[#allocation11 + $0x404] sm:$0xf0]  ;;  %v2992_v7 = vor.u32 %v3903_v60, %v2991_v59  ;;  %v2871_v60 = vld [vmem:[#allocation11 + $0x1b0] sm:$0xf] }
  0xa2   :  { %v3160_v16 = vor.u32 %v3945_v6, %v3159_v5  ;;  %v3921_v59 = vld [vmem:[#allocation11 + $0x344] sm:$0xf0]  ;;  %v3915_v5 = vld [vmem:[#allocation11 + $0x314] sm:$0xf0]  ;;  %v2872_v6 = vor.u32 %v3873_v61, %v2871_v60  ;;  %v3663_v61 = vld [vmem:[#allocation11 + $0x7e0] sm:$0xf] }
  0xa3   :  { %v165_v9 = vmax.f32 %v162_v8, 0.0  ;;  %v2967_v8 = vld [vmem:[#allocation11 + $0x270] sm:$0xf]  ;;  %v3064_v3 = vor.u32 %v3921_v59, %v3063_v57  ;;  %v2681_v57 = vld [vmem:[#allocation11 + $0x48] sm:$0xf0] }
  0xa4   :  { %v3471_v59 = vld [vmem:[#allocation11 + $0x660] sm:$0xf]  ;;  %v4023_v60 = vld [vmem:[#allocation11 + $0x674] sm:$0xf0] }
  0xa5   :  { %v166_v10 = vpack.c.bf16 %v165_v9, %v165_v9  ;;  %v3897_v9 = vld [vmem:[#allocation11 + $0x284] sm:$0xf0] }
  0xa6   :  { %v2968_v19 = vor.u32 %v3897_v9, %v2967_v8  ;;  %v2847_v8 = vld [vmem:[#allocation11 + $0x180] sm:$0xf]  ;;  %v3867_v9 = vld [vmem:[#allocation11 + $0x194] sm:$0xf0] }
  0xa7   :  { %2622 = vmatmul.msk.bf16.vlgmr.msra.gmra.mxu1 %vm203_vm1, %v166_v10  ;;  %v2728_v10 = vor.u32 %v3837_v0, %v2727_v63  ;;  %v3231_v0 = vld [vmem:[#allocation11 + $0x480] sm:$0xf]  ;;  %v2848_v18 = vor.u32 %v3867_v9, %v2847_v8  ;;  %v3639_v8 = vld [vmem:[#allocation11 + $0x7b0] sm:$0xf] }
  0xa8   :  { %v163_v11 = vpop.f32.mrf.mxu0  ;;  %2146 = vmatpush.bf16.msra.mxu1 %v3400_v51  ;;  %v3255_v51 = vld [vmem:[#allocation11 + $0x4b0] sm:$0xf] }
  0xa9   :  { %v2703_v11 = vld [vmem:[#allocation11 + $0x60] sm:$0xf]  ;;  %2111 = vmatpush.bf16.msra.mxu0 %v2728_v10 }
  0xaa   :  { %v2704_v22 = vor.u32 %v3831_v13, %v2703_v11  ;;  %v2825_v11 = vld [vmem:[#allocation11 + $0x168] sm:$0xf0]  ;;  %v4101_v13 = vld [vmem:[#allocation11 + $0x8e4] sm:$0xf0] }
  0xac   :  { %2147 = vmatpush.bf16.msra.mxu1 %v3376_v62  ;;  %v3256_v62 = vor.u32 %v3969_v52, %v3255_v51  ;;  %v3906_v51 = vld [vmem:[#allocation11 + $0x2d4] sm:$0xf]  ;;  %v3017_v52 = vld [vmem:[#allocation11 + $0x2e8] sm:$0xf0] }
  0xad   :  { %2112 = vmatpush.bf16.msra.mxu0 %v2704_v22  ;;  %v2801_v22 = vld [vmem:[#allocation11 + $0x138] sm:$0xf0] }
  0xae   :  { %v2804_v26 = vor.u32 %v3852_v20, %v2801_v22  ;;  %v3888_v20 = vld [vmem:[#allocation11 + $0x244] sm:$0xf] }
  0xb0   :  { %2148 = vmatpush.bf16.msra.mxu1 %v3352_v12  ;;  %v3783_v12 = vld [vmem:[#allocation11 + $0x8d0] sm:$0xf] }
  0xb1   :  { %2113 = vmatpush.bf16.msra.mxu0 %v2680_v34  ;;  %v3784_v21 = vor.u32 %v4101_v13, %v3783_v12  ;;  %v2969_v12 = vld [vmem:[#allocation11 + $0x288] sm:$0xf0] }
  0xb4   :  { %2149 = vmatpush.bf16.msra.mxu1 %v3328_v24  ;;  %v4095_v24 = vld [vmem:[#allocation11 + $0x8b4] sm:$0xf0] }
  0xb8   :  { %2150 = vmatpush.bf16.msra.mxu1 %v3304_v36  ;;  %v3711_v36 = vld [vmem:[#allocation11 + $0x840] sm:$0xf] }
 0x124   :  { %v216_v40 = vpop.f32.mrf.mxu1 }
 0x125   :  { %v217_v41 = vadd.f32 %v4117_v38, %v216_v40  ;;  %v3279_v38 = vld [vmem:[#allocation11 + $0x4e0] sm:$0xf]  ;;  %v3591_v40 = vld [vmem:[#allocation11 + $0x750] sm:$0xf] }
 0x126   :  { %v3280_v49 = vor.u32 %v3975_v39, %v3279_v38 }
 0x127   :  { %v220_v48 = vmax.f32 %v217_v41, 0.0  ;;  %v4053_v41 = vld [vmem:[#allocation11 + $0x764] sm:$0xf0] }
 0x128   :  { %v3592_v50 = vor.u32 %v4053_v41, %v3591_v40  ;;  %2151 = vmatpush.bf16.msra.mxu1 %v3280_v49  ;;  %v3834_v40 = vld [vmem:[#allocation11 + $0x94] sm:$0xf]  ;;  %v2729_v41 = vld [vmem:[#allocation11 + $0xa8] sm:$0xf0]  ;;  %v3496_v49 = vor.u32 %v4029_v47, %v3495_v46 }
 0x129   :  { %v4419_v53 = vpack.c.bf16 %v220_v48, %v220_v48  ;;  %v2656_v48 = vor.u32 %v3819_v37, %v2655_v35  ;;  %v2753_v35 = vld [vmem:[#allocation11 + $0xd8] sm:$0xf0]  ;;  %v4083_v37 = vld [vmem:[#allocation11 + $0x854] sm:$0xf0] }
 0x12a   :  { %v2756_v38 = vor.u32 %v3840_v33, %v2753_v35  ;;  %v3712_v39 = vor.u32 %v4083_v37, %v3711_v36  ;;  %v4433_v33 = vld [vmem:[#allocation10] sm:$0x3f] }
 0x12b   :  { %2647 = vmatmul.msk.bf16.vlgmr.msra.gmra.mxu2 %vm148_vm0, %v4419_v53  ;;  %2648 = vmatmul.msk.bf16.vlgmr.msra.gmra.mxu3 %vm148_vm0, %v4419_v53  ;;  %v2849_v35 = vld [vmem:[#allocation11 + $0x198] sm:$0xf0]  ;;  %v232_v37 = vperm.slane %v4433_v33, 2 }
 0x12c   :  { %2649 = vmatmul.msk.bf16.vlgmr.msrb.gmra.mxu0 %vm148_vm0, %v4419_v53  ;;  %2652 = vmatmul.msk.bf16.vlgmr.msrb.gmra.mxu1 %vm148_vm0, %v4419_v53  ;;  %v218_v1 = vpop.f32.mrf.mxu1 }
 0x12d   :  { %2133 = vmatpush.bf16.msra.mxu3 %v3208_v54  ;;  %2120 = vmatpush.bf16.msra.mxu2 %v3016_v56  ;;  %v3567_v54 = vld [vmem:[#allocation11 + $0x720] sm:$0xf]  ;;  %v3088_v56 = vor.u32 %v3927_v45, %v3087_v43  ;;  %v3543_v1 = vld [vmem:[#allocation11 + $0x6f0] sm:$0xf]  ;;  %v3828_v43 = vld [vmem:[#allocation11 + $0x64] sm:$0xf] }
 0x12e   :  { %2114 = vmatpush.bf16.msra.mxu0 %v2656_v48  ;;  %v3568_v63 = vor.u32 %v4047_v55, %v3567_v54  ;;  %2152 = vmatpush.bf16.msra.mxu1 %v3256_v62  ;;  %v3544_v14 = vor.u32 %v4041_v2, %v3543_v1  ;;  %v3687_v48 = vld [vmem:[#allocation11 + $0x810] sm:$0xf]  ;;  %v3020_v55 = vor.u32 %v3906_v51, %v3017_v52  ;;  %v3569_v51 = vld [vmem:[#allocation11 + $0x738] sm:$0xf0] }
 0x12f   :  { %v3472_v62 = vor.u32 %v4023_v60, %v3471_v59 }
 0x131   :  { %2134 = vmatpush.bf16.msra.mxu3 %v3184_v4  ;;  %2121 = vmatpush.bf16.msra.mxu2 %v2992_v7  ;;  %v3039_v4 = vld [vmem:[#allocation11 + $0x300] sm:$0xf]  ;;  %v3858_v7 = vld [vmem:[#allocation11 + $0x154] sm:$0xf] }
 0x132   :  { %2159 = vmatpush.bf16.msrb.mxu0 %v3592_v50  ;;  %v3040_v17 = vor.u32 %v3915_v5, %v3039_v4  ;;  %v4077_v50 = vld [vmem:[#allocation11 + $0x824] sm:$0xf0]  ;;  %v2657_v4 = vld [vmem:[#allocation11 + $0x18] sm:$0xf0] }
 0x133   :  { %v3688_v54 = vor.u32 %v4077_v50, %v3687_v48  ;;  %v4044_v50 = vld [vmem:[#allocation11 + $0x724] sm:$0xf] }
 0x135   :  { %2135 = vmatpush.bf16.msra.mxu3 %v3160_v16  ;;  %2122 = vmatpush.bf16.msra.mxu2 %v2968_v19  ;;  %v4035_v16 = vld [vmem:[#allocation11 + $0x6d4] sm:$0xf0]  ;;  %v2828_v19 = vor.u32 %v3858_v7, %v2825_v11  ;;  %v4017_v7 = vld [vmem:[#allocation11 + $0x644] sm:$0xf0]  ;;  %v3894_v11 = vld [vmem:[#allocation11 + $0x274] sm:$0xf] }
 0x136   :  { %2160 = vmatpush.bf16.msrb.mxu0 %v3568_v63  ;;  %v3520_v25 = vor.u32 %v4035_v16, %v3519_v15  ;;  %v4071_v63 = vld [vmem:[#allocation11 + $0x7f4] sm:$0xf0]  ;;  %v3423_v15 = vld [vmem:[#allocation11 + $0x600] sm:$0xf] }
 0x137   :  { %v3664_v1 = vor.u32 %v4071_v63, %v3663_v61  ;;  %v4011_v16 = vld [vmem:[#allocation11 + $0x614] sm:$0xf0]  ;;  %v3572_v63 = vor.u32 %v4044_v50, %v3569_v51  ;;  %v4098_v51 = vld [vmem:[#allocation11 + $0x8d4] sm:$0xf] }
 0x139   :  { %2136 = vmatpush.bf16.msra.mxu3 %v3136_v28  ;;  %2123 = vmatpush.bf16.msra.mxu2 %v2944_v31  ;;  %v3760_v28 = vor.u32 %v4095_v24, %v3759_v23  ;;  %v4089_v31 = vld [vmem:[#allocation11 + $0x884] sm:$0xf0]  ;;  %v3882_v24 = vld [vmem:[#allocation11 + $0x214] sm:$0xf] }
 0x13a   :  { %2161 = vmatpush.bf16.msrb.mxu0 %v3544_v14  ;;  %v3736_v34 = vor.u32 %v4089_v31, %v3735_v30  ;;  %v2972_v14 = vor.u32 %v3894_v11, %v2969_v12  ;;  %v3870_v30 = vld [vmem:[#allocation11 + $0x1b4] sm:$0xf]  ;;  %v2873_v31 = vld [vmem:[#allocation11 + $0x1c8] sm:$0xf0] }
 0x13b   :  { %2650 = vmatmul.msk.bf16.vlgmr.msrb.gmra.mxu2 %vm148_vm0, %v4419_v53  ;;  %2651 = vmatmul.msk.bf16.vlgmr.msrb.gmra.mxu3 %vm148_vm0, %v4419_v53  ;;  %v3963_v53 = vld [vmem:[#allocation11 + $0x494] sm:$0xf0] }
 0x13c   :  { %v3232_v10 = vor.u32 %v3963_v53, %v3231_v0  ;;  %v3900_v0 = vld [vmem:[#allocation11 + $0x2a4] sm:$0xf]  ;;  %v2993_v53 = vld [vmem:[#allocation11 + $0x2b8] sm:$0xf0] }
 0x13d   :  { %2137 = vmatpush.bf16.msra.mxu3 %v3112_v42  ;;  %2124 = vmatpush.bf16.msra.mxu2 %v2920_v44  ;;  %v2732_v42 = vor.u32 %v3834_v40, %v2729_v41  ;;  %v2705_v44 = vld [vmem:[#allocation11 + $0x78] sm:$0xf0]  ;;  %v2996_v2 = vor.u32 %v3900_v0, %v2993_v53  ;;  %v4050_v41 = vld [vmem:[#allocation11 + $0x754] sm:$0xf] }
 0x13e   :  { %2153 = vmatpush.bf16.msra.mxu1 %v3232_v10  ;;  %2162 = vmatpush.bf16.msrb.mxu0 %v3520_v25  ;;  %v2708_v45 = vor.u32 %v3828_v43, %v2705_v44  ;;  %v4065_v10 = vld [vmem:[#allocation11 + $0x7c4] sm:$0xf0]  ;;  %v2921_v25 = vld [vmem:[#allocation11 + $0x228] sm:$0xf0]  ;;  %v230_v43 = vperm.slane %v4433_v33, 0  ;;  %v231_v44 = vperm.slane %v4433_v33, 1 }
 0x13f   :  { %v3640_v13 = vor.u32 %v4065_v10, %v3639_v8  ;;  %v4038_v53 = vld [vmem:[#allocation11 + $0x6f4] sm:$0xf]  ;;  %v3377_v8 = vld [vmem:[#allocation11 + $0x5b8] sm:$0xf0] }
 0x141   :  { %2138 = vmatpush.bf16.msra.mxu3 %v3088_v56  ;;  %2125 = vmatpush.bf16.msra.mxu2 %v2896_v58  ;;  %v3822_v56 = vld [vmem:[#allocation11 + $0x34] sm:$0xf] }
 0x142   :  { %2163 = vmatpush.bf16.msrb.mxu0 %v3496_v49  ;;  %v2684_v58 = vor.u32 %v3822_v56, %v2681_v57  ;;  %2198 = vmatpush.bf16.msrb.mxu1 %v3020_v55  ;;  %v3954_v55 = vld [vmem:[#allocation11 + $0x454] sm:$0xf]  ;;  %v3209_v56 = vld [vmem:[#allocation11 + $0x468] sm:$0xf0] }
 0x143   :  { %v4002_v57 = vld [vmem:[#allocation11 + $0x5d4] sm:$0xf]  ;;  %v3212_v0 = vor.u32 %v3954_v55, %v3209_v56  ;;  %v3449_v55 = vld [vmem:[#allocation11 + $0x648] sm:$0xf0] }
 0x145   :  { %2139 = vmatpush.bf16.msra.mxu3 %v3064_v3  ;;  %2126 = vmatpush.bf16.msra.mxu2 %v2872_v6  ;;  %v3816_v3 = vld [vmem:[#allocation11 + $0x4] sm:$0xf]  ;;  %v3447_v6 = vld [vmem:[#allocation11 + $0x630] sm:$0xf] }
 0x146   :  { %2164 = vmatpush.bf16.msrb.mxu0 %v3472_v62  ;;  %v2660_v5 = vor.u32 %v3816_v3, %v2657_v4  ;;  %2199 = vmatpush.bf16.msrb.mxu1 %v2996_v2  ;;  %v3448_v9 = vor.u32 %v4017_v7, %v3447_v6  ;;  %v3185_v6 = vld [vmem:[#allocation11 + $0x438] sm:$0xf0]  ;;  %v3996_v7 = vld [vmem:[#allocation11 + $0x5a4] sm:$0xf] }
 0x149   :  { %2140 = vmatpush.bf16.msra.mxu3 %v3040_v17  ;;  %2127 = vmatpush.bf16.msra.mxu2 %v2848_v18  ;;  %v3615_v17 = vld [vmem:[#allocation11 + $0x780] sm:$0xf]  ;;  %v3424_v18 = vor.u32 %v4011_v16, %v3423_v15  ;;  %v3380_v15 = vor.u32 %v3996_v7, %v3377_v8  ;;  %v3942_v16 = vld [vmem:[#allocation11 + $0x3f4] sm:$0xf]  ;;  %v4008_v8 = vld [vmem:[#allocation11 + $0x604] sm:$0xf] }
 0x14a   :  { %2165 = vmatpush.bf16.msrb.mxu0 %v3448_v9  ;;  %2200 = vmatpush.bf16.msrb.mxu1 %v2972_v14  ;;  %v3521_v14 = vld [vmem:[#allocation11 + $0x6d8] sm:$0xf0] }
 0x14d   :  { %2185 = vmatpush.bf16.msrb.mxu3 %v2828_v19  ;;  %2172 = vmatpush.bf16.msrb.mxu2 %v3784_v21  ;;  %v4059_v19 = vld [vmem:[#allocation11 + $0x794] sm:$0xf0]  ;;  %v2945_v21 = vld [vmem:[#allocation11 + $0x258] sm:$0xf0] }
 0x14e   :  { %v3616_v22 = vor.u32 %v4059_v19, %v3615_v17  ;;  %v2948_v23 = vor.u32 %v3888_v20, %v2945_v21  ;;  %2166 = vmatpush.bf16.msrb.mxu0 %v3424_v18  ;;  %v3161_v17 = vld [vmem:[#allocation11 + $0x408] sm:$0xf0]  ;;  %v235_v18 = vperm.slane %v4433_v33, 5  ;;  %v3990_v19 = vld [vmem:[#allocation11 + $0x574] sm:$0xf] }
 0x14f   :  { %v3353_v20 = vld [vmem:[#allocation11 + $0x588] sm:$0xf0] }
 0x150   :  { %2201 = vmatpush.bf16.msrb.mxu1 %v2948_v23  ;;  %v4026_v23 = vld [vmem:[#allocation11 + $0x694] sm:$0xf] }
 0x151   :  { %2186 = vmatpush.bf16.msrb.mxu3 %v2804_v26  ;;  %2173 = vmatpush.bf16.msrb.mxu2 %v3760_v28  ;;  %v2924_v26 = vor.u32 %v3882_v24, %v2921_v25  ;;  %v2897_v28 = vld [vmem:[#allocation11 + $0x1f8] sm:$0xf0]  ;;  %v3497_v24 = vld [vmem:[#allocation11 + $0x6a8] sm:$0xf0]  ;;  %v3356_v25 = vor.u32 %v3990_v19, %v3353_v20  ;;  %v4086_v20 = vld [vmem:[#allocation11 + $0x874] sm:$0xf] }
 0x152   :  { %v2900_v29 = vor.u32 %v3876_v27, %v2897_v28  ;;  %v234_v27 = vperm.slane %v4433_v33, 4  ;;  %v3936_v28 = vld [vmem:[#allocation11 + $0x3c4] sm:$0xf] }
 0x154   :  { %2202 = vmatpush.bf16.msrb.mxu1 %v2924_v26  ;;  %v233_v26 = vperm.slane %v4433_v33, 3  ;;  %v3113_v33 = vld [vmem:[#allocation11 + $0x3a8] sm:$0xf0] }
 0x155   :  { %2187 = vmatpush.bf16.msrb.mxu3 %v2780_v32  ;;  %2174 = vmatpush.bf16.msrb.mxu2 %v3736_v34  ;;  %v2876_v32 = vor.u32 %v3870_v30, %v2873_v31  ;;  %v3864_v34 = vld [vmem:[#allocation11 + $0x184] sm:$0xf] }
 0x156   :  { %v2852_v36 = vor.u32 %v3864_v34, %v2849_v35  ;;  %v3984_v31 = vld [vmem:[#allocation11 + $0x544] sm:$0xf]  ;;  %v3500_v34 = vor.u32 %v4026_v23, %v3497_v24  ;;  %v3191_v23 = vld [vmem:[#allocation11 + $0x428] sm:$0xf] }
 0x158   :  { %2203 = vmatpush.bf16.msrb.mxu1 %v2900_v29  ;;  %v3137_v29 = vld [vmem:[#allocation11 + $0x3d8] sm:$0xf0] }
 0x159   :  { %2188 = vmatpush.bf16.msrb.mxu3 %v2756_v38  ;;  %2175 = vmatpush.bf16.msrb.mxu2 %v3712_v39 }
 0x15c   :  { %2204 = vmatpush.bf16.msrb.mxu1 %v2876_v32  ;;  %v3329_v32 = vld [vmem:[#allocation11 + $0x558] sm:$0xf0] }
 0x15d   :  { %2189 = vmatpush.bf16.msrb.mxu3 %v2732_v42  ;;  %2176 = vmatpush.bf16.msrb.mxu2 %v3688_v54  ;;  %v3593_v42 = vld [vmem:[#allocation11 + $0x768] sm:$0xf0] }
 0x15e   :  { %v3596_v46 = vor.u32 %v4050_v41, %v3593_v42 }
 0x160   :  { %2205 = vmatpush.bf16.msrb.mxu1 %v2852_v36 }
 0x161   :  { %2190 = vmatpush.bf16.msrb.mxu3 %v2708_v45  ;;  %2177 = vmatpush.bf16.msrb.mxu2 %v3664_v1  ;;  %v3545_v1 = vld [vmem:[#allocation11 + $0x708] sm:$0xf0] }
 0x162   :  { %v3548_v9 = vor.u32 %v4038_v53, %v3545_v1  ;;  %v3281_v53 = vld [vmem:[#allocation11 + $0x4f8] sm:$0xf0] }
 0x165   :  { %2191 = vmatpush.bf16.msrb.mxu3 %v2684_v58  ;;  %2178 = vmatpush.bf16.msrb.mxu2 %v3640_v13  ;;  %v3401_v58 = vld [vmem:[#allocation11 + $0x5e8] sm:$0xf0]  ;;  %v4032_v13 = vld [vmem:[#allocation11 + $0x6c4] sm:$0xf] }
 0x166   :  { %v3404_v4 = vor.u32 %v4002_v57, %v3401_v58  ;;  %v3524_v21 = vor.u32 %v4032_v13, %v3521_v14  ;;  %v3958_v13 = vld [vmem:[#allocation11 + $0x46c] sm:$0xf0]  ;;  %v3918_v14 = vld [vmem:[#allocation11 + $0x334] sm:$0xf] }
 0x169   :  { %2192 = vmatpush.bf16.msrb.mxu3 %v2660_v5  ;;  %2179 = vmatpush.bf16.msrb.mxu2 %v3616_v22  ;;  %v3948_v5 = vld [vmem:[#allocation11 + $0x424] sm:$0xf]  ;;  %v3164_v22 = vor.u32 %v3942_v16, %v3161_v17  ;;  %v3065_v16 = vld [vmem:[#allocation11 + $0x348] sm:$0xf0]  ;;  %v3966_v17 = vld [vmem:[#allocation11 + $0x4b4] sm:$0xf] }
 0x16a   :  { %v3188_v12 = vor.u32 %v3948_v5, %v3185_v6  ;;  %v3761_v5 = vld [vmem:[#allocation11 + $0x8b8] sm:$0xf0]  ;;  %v3068_v24 = vor.u32 %v3918_v14, %v3065_v16  ;;  %v2759_v14 = vld [vmem:[#allocation11 + $0xc8] sm:$0xf] }
 0x1a9   :  { %v310_v38 = vpop.f32.mrf.mxu0  ;;  %v4436_v39 = vpop.f32.mrf.mxu1 }
 0x1aa   :  { %v311_v40 = vadd.f32 %v310_v38, %v232_v37  ;;  %v350_v30 = vadd.f32 %v4436_v39, %v235_v18  ;;  %v3140_v37 = vor.u32 %v3936_v28, %v3137_v29  ;;  %v4020_v38 = vld [vmem:[#allocation11 + $0x664] sm:$0xf]  ;;  %v3978_v39 = vld [vmem:[#allocation11 + $0x514] sm:$0xf]  ;;  %v3257_v18 = vld [vmem:[#allocation11 + $0x4c8] sm:$0xf0] }
 0x1ab   :  { %v3041_v28 = vld [vmem:[#allocation11 + $0x318] sm:$0xf0] }
 0x1ac   :  { %v355_v45 = vmax.f32 %v311_v40, 0.0  ;;  %v3473_v40 = vld [vmem:[#allocation11 + $0x678] sm:$0xf0] }
 0x1ad   :  { %v3476_v50 = vor.u32 %v4020_v38, %v3473_v40  ;;  %v3023_v38 = vld [vmem:[#allocation11 + $0x2d8] sm:$0xf]  ;;  %v3910_v40 = vld [vmem:[#allocation11 + $0x2ec] sm:$0xf0] }
 0x1ae   :  { %v4440_v47 = vpack.c.bf16 %v355_v45, %v355_v45  ;;  %v284_v48 = vpop.f32.mrf.mxu2  ;;  %v297_v49 = vpop.f32.mrf.mxu3  ;;  %v358_v45 = vmax.f32 %v350_v30, 0.0  ;;  %v3960_v30 = vld [vmem:[#allocation11 + $0x484] sm:$0xf] }
 0x1af   :  { %v285_v52 = vadd.f32 %v284_v48, %v230_v43  ;;  %v298_v54 = vadd.f32 %v297_v49, %v231_v44  ;;  %v3332_v43 = vor.u32 %v3984_v31, %v3329_v32  ;;  %v3930_v44 = vld [vmem:[#allocation11 + $0x394] sm:$0xf]  ;;  %v3233_v31 = vld [vmem:[#allocation11 + $0x498] sm:$0xf0]  ;;  %v4080_v32 = vld [vmem:[#allocation11 + $0x844] sm:$0xf] }
 0x1b0   :  { %2141 = vmatmul.bf16.vlgmr.msra.gmra.mxu3 %v4440_v47  ;;  %v3116_v58 = vor.u32 %v3930_v44, %v3113_v33  ;;  %v3946_v44 = vld [vmem:[#allocation11 + $0x40c] sm:$0xf0] }
 0x1b1   :  { %v353_v59 = vmax.f32 %v285_v52, 0.0  ;;  %v354_v60 = vmax.f32 %v298_v54, 0.0  ;;  %2237 = vmatpush.bf16.msra.mxu3 %v3596_v46  ;;  %v312_v61 = vpop.f32.mrf.mxu0  ;;  %v351_v62 = vpop.f32.mrf.mxu1  ;;  %v3305_v46 = vld [vmem:[#allocation11 + $0x528] sm:$0xf0]  ;;  %v4014_v54 = vld [vmem:[#allocation11 + $0x634] sm:$0xf] }
 0x1b2   :  { %v3785_v52 = vld [vmem:[#allocation11 + $0x8e8] sm:$0xf0]  ;;  %v4458_v61 = vpack.c.bf16 %v358_v45, %v358_v45  ;;  %v3452_v1 = vor.u32 %v4014_v54, %v3449_v55  ;;  %v3904_v54 = vld [vmem:[#allocation11 + $0x2bc] sm:$0xf0]  ;;  %v3143_v55 = vld [vmem:[#allocation11 + $0x3c8] sm:$0xf] }
 0x1b3   :  { %v4443_v2 = vpack.c.bf16 %v353_v59, %v353_v59  ;;  %v4445_v3 = vpack.c.bf16 %v354_v60, %v354_v60  ;;  %v3308_v59 = vor.u32 %v3978_v39, %v3305_v46  ;;  %v3924_v60 = vld [vmem:[#allocation11 + $0x364] sm:$0xf]  ;;  %v3788_v62 = vor.u32 %v4098_v51, %v3785_v52  ;;  %v4074_v39 = vld [vmem:[#allocation11 + $0x814] sm:$0xf]  ;;  %v2999_v52 = vld [vmem:[#allocation11 + $0x2a8] sm:$0xf] }
 0x1b4   :  { %v3024_v46 = vor.u32 %v3910_v40, %v3023_v38 }
 0x1b5   :  { %2238 = vmatpush.bf16.msra.mxu3 %v3572_v63  ;;  %2115 = vmatmul.bf16.vlgmr.msra.gmra.mxu0 %v4443_v2  ;;  %v3089_v63 = vld [vmem:[#allocation11 + $0x378] sm:$0xf0] }
 0x1b6   :  { %2128 = vmatmul.bf16.vlgmr.msra.gmra.mxu2 %v4445_v3  ;;  %2211 = vmatpush.bf16.msra.mxu0 %v3212_v0  ;;  %v286_v10 = vpop.f32.mrf.mxu2  ;;  %v299_v11 = vpop.f32.mrf.mxu3  ;;  %v3972_v0 = vld [vmem:[#allocation11 + $0x4e4] sm:$0xf] }
 0x1b7   :  { %2224 = vmatpush.bf16.msra.mxu2 %v3404_v4  ;;  %v4092_v4 = vld [vmem:[#allocation11 + $0x8a4] sm:$0xf]  ;;  %v3092_v10 = vor.u32 %v3924_v60, %v3089_v63  ;;  %v3284_v11 = vor.u32 %v3972_v0, %v3281_v53  ;;  %v3000_v63 = vor.u32 %v3904_v54, %v2999_v52  ;;  %v3665_v0 = vld [vmem:[#allocation11 + $0x7f8] sm:$0xf0]  ;;  %v2783_v53 = vld [vmem:[#allocation11 + $0xf8] sm:$0xf] }
 0x1b9   :  { %2239 = vmatpush.bf16.msra.mxu3 %v3548_v9  ;;  %v3425_v9 = vld [vmem:[#allocation11 + $0x618] sm:$0xf0] }
 0x1ba   :  { %2212 = vmatpush.bf16.msra.mxu0 %v3188_v12  ;;  %v3215_v12 = vld [vmem:[#allocation11 + $0x458] sm:$0xf]  ;;  %v3428_v19 = vor.u32 %v4008_v8, %v3425_v9  ;;  %v3934_v8 = vld [vmem:[#allocation11 + $0x3ac] sm:$0xf0] }
 0x1bb   :  { %2225 = vmatpush.bf16.msra.mxu2 %v3380_v15  ;;  %v3764_v15 = vor.u32 %v4092_v4, %v3761_v5  ;;  %v2975_v5 = vld [vmem:[#allocation11 + $0x278] sm:$0xf] }
 0x1bd   :  { %2240 = vmatpush.bf16.msra.mxu3 %v3524_v21  ;;  %v3737_v21 = vld [vmem:[#allocation11 + $0x888] sm:$0xf0] }
 0x1be   :  { %2213 = vmatpush.bf16.msra.mxu0 %v3164_v22  ;;  %v323_v35 = vpop.f32.mrf.mxu2  ;;  %v336_v36 = vpop.f32.mrf.mxu3  ;;  %v3216_v22 = vor.u32 %v3958_v13, %v3215_v12  ;;  %v3740_v29 = vor.u32 %v4086_v20, %v3737_v21  ;;  %v3641_v13 = vld [vmem:[#allocation11 + $0x7c8] sm:$0xf0]  ;;  %v3928_v20 = vld [vmem:[#allocation11 + $0x37c] sm:$0xf0] }
 0x1bf   :  { %2226 = vmatpush.bf16.msra.mxu2 %v3356_v25  ;;  %v324_v41 = vadd.f32 %v323_v35, %v233_v26  ;;  %v337_v42 = vadd.f32 %v336_v36, %v234_v27  ;;  %v3260_v25 = vor.u32 %v3966_v17, %v3257_v18  ;;  %v3952_v26 = vld [vmem:[#allocation11 + $0x43c] sm:$0xf0]  ;;  %v3912_v27 = vld [vmem:[#allocation11 + $0x304] sm:$0xf]  ;;  %v2831_v35 = vld [vmem:[#allocation11 + $0x158] sm:$0xf] }
 0x1c0   :  { %2193 = vmatmul.bf16.vlgmr.msrb.gmra.mxu3 %v4443_v2  ;;  %v3862_v36 = vld [vmem:[#allocation11 + $0x16c] sm:$0xf0]  ;;  %v2951_v17 = vld [vmem:[#allocation11 + $0x248] sm:$0xf]  ;;  %v3892_v18 = vld [vmem:[#allocation11 + $0x25c] sm:$0xf0] }
 0x1c1   :  { %v356_v48 = vmax.f32 %v324_v41, 0.0  ;;  %v357_v49 = vmax.f32 %v337_v42, 0.0  ;;  %2241 = vmatpush.bf16.msra.mxu3 %v3500_v34  ;;  %v3713_v34 = vld [vmem:[#allocation11 + $0x858] sm:$0xf0]  ;;  %v3044_v41 = vor.u32 %v3912_v27, %v3041_v28  ;;  %v3236_v42 = vor.u32 %v3960_v30, %v3233_v31  ;;  %v3838_v27 = vld [vmem:[#allocation11 + $0xac] sm:$0xf0] }
 0x1c2   :  { %2214 = vmatpush.bf16.msra.mxu0 %v3140_v37  ;;  %v3192_v37 = vor.u32 %v3952_v26, %v3191_v23  ;;  %v3716_v33 = vor.u32 %v4080_v32, %v3713_v34  ;;  %v2832_v45 = vor.u32 %v3862_v36, %v2831_v35  ;;  %v4056_v23 = vld [vmem:[#allocation11 + $0x784] sm:$0xf]  ;;  %v2735_v26 = vld [vmem:[#allocation11 + $0x98] sm:$0xf]  ;;  %v3886_v30 = vld [vmem:[#allocation11 + $0x22c] sm:$0xf0] }
 0x1c3   :  { %v4454_v56 = vpack.c.bf16 %v356_v48, %v356_v48  ;;  %v4456_v57 = vpack.c.bf16 %v357_v49, %v357_v49  ;;  %2227 = vmatpush.bf16.msra.mxu2 %v3332_v43  ;;  %v3167_v43 = vld [vmem:[#allocation11 + $0x3f8] sm:$0xf]  ;;  %v3689_v48 = vld [vmem:[#allocation11 + $0x828] sm:$0xf0]  ;;  %v2807_v49 = vld [vmem:[#allocation11 + $0x128] sm:$0xf] }
 0x1c4   :  { %v3168_v51 = vor.u32 %v3946_v44, %v3167_v43  ;;  %v2927_v28 = vld [vmem:[#allocation11 + $0x218] sm:$0xf]  ;;  %v4006_v32 = vld [vmem:[#allocation11 + $0x5ec] sm:$0xf0]  ;;  %v2903_v43 = vld [vmem:[#allocation11 + $0x1e8] sm:$0xf] }
 0x1c5   :  { %2242 = vmatpush.bf16.msra.mxu3 %v3476_v50  ;;  %2154 = vmatmul.bf16.vlgmr.msra.gmra.mxu1 %v4454_v56  ;;  %v3856_v50 = vld [vmem:[#allocation11 + $0x13c] sm:$0xf0]  ;;  %v3407_v31 = vld [vmem:[#allocation11 + $0x5d8] sm:$0xf]  ;;  %v3922_v35 = vld [vmem:[#allocation11 + $0x34c] sm:$0xf0]  ;;  %v2928_v38 = vor.u32 %v3886_v30, %v2927_v28 }
 0x1c6   :  { %2167 = vmatmul.bf16.vlgmr.msrb.gmra.mxu0 %v4456_v57  ;;  %2180 = vmatmul.bf16.vlgmr.msrb.gmra.mxu2 %v4458_v61  ;;  %v325_v6 = vpop.f32.mrf.mxu2  ;;  %v338_v7 = vpop.f32.mrf.mxu3  ;;  %v2808_v60 = vor.u32 %v3856_v50, %v2807_v49  ;;  %v3071_v34 = vld [vmem:[#allocation11 + $0x338] sm:$0xf]  ;;  %v3408_v40 = vor.u32 %v4006_v32, %v3407_v31  ;;  %v3859_v50 = vld [vmem:[#allocation11 + $0x15c] sm:$0xf]  ;;  %v3575_v28 = vld [vmem:[#allocation11 + $0x728] sm:$0xf] }
 0x1c7   :  { %2215 = vmatpush.bf16.msra.mxu0 %v3116_v58  ;;  %2228 = vmatpush.bf16.msra.mxu2 %v3308_v59  ;;  %v3940_v58 = vld [vmem:[#allocation11 + $0x3dc] sm:$0xf0]  ;;  %v3692_v59 = vor.u32 %v4074_v39, %v3689_v48  ;;  %v3898_v6 = vld [vmem:[#allocation11 + $0x28c] sm:$0xf0]  ;;  %v3119_v7 = vld [vmem:[#allocation11 + $0x398] sm:$0xf]  ;;  %v3072_v44 = vor.u32 %v3922_v35, %v3071_v34 }
 0x1c8   :  { %2250 = vmatpush.bf16.msra.mxu1 %v3788_v62  ;;  %v4068_v62 = vld [vmem:[#allocation11 + $0x7e4] sm:$0xf]  ;;  %v3144_v4 = vor.u32 %v3940_v58, %v3143_v55  ;;  %v2976_v12 = vor.u32 %v3898_v6, %v2975_v5  ;;  %v3120_v16 = vor.u32 %v3934_v8, %v3119_v7  ;;  %v4000_v39 = vld [vmem:[#allocation11 + $0x5bc] sm:$0xf0]  ;;  %v2687_v55 = vld [vmem:[#allocation11 + $0x38] sm:$0xf] }
 0x1c9   :  { %2243 = vmatpush.bf16.msra.mxu3 %v3452_v1  ;;  %v3850_v1 = vld [vmem:[#allocation11 + $0x10c] sm:$0xf0]  ;;  %v3668_v9 = vor.u32 %v4068_v62, %v3665_v0  ;;  %v3916_v48 = vld [vmem:[#allocation11 + $0x31c] sm:$0xf0]  ;;  %v2809_v5 = vld [vmem:[#allocation11 + $0x140] sm:$0xf0] }
 0x1ca   :  { %v3826_v58 = vld [vmem:[#allocation11 + $0x4c] sm:$0xf0]  ;;  %v2663_v6 = vld [vmem:[#allocation11 + $0x8] sm:$0xf]  ;;  %v4048_v30 = vld [vmem:[#allocation11 + $0x73c] sm:$0xf0] }
 0x1cb   :  { %2216 = vmatpush.bf16.msra.mxu0 %v3092_v10  ;;  %2229 = vmatpush.bf16.msra.mxu2 %v3284_v11  ;;  %v2784_v10 = vor.u32 %v3850_v1, %v2783_v53  ;;  %v4062_v11 = vld [vmem:[#allocation11 + $0x7b4] sm:$0xf]  ;;  %v3874_v62 = vld [vmem:[#allocation11 + $0x1cc] sm:$0xf0]  ;;  %v2688_v1 = vor.u32 %v3826_v58, %v2687_v55  ;;  %v3767_v31 = vld [vmem:[#allocation11 + $0x8a8] sm:$0xf] }
 0x1cc   :  { %2251 = vmatpush.bf16.msra.mxu1 %v3764_v15  ;;  %v3844_v15 = vld [vmem:[#allocation11 + $0xdc] sm:$0xf0]  ;;  %v3644_v21 = vor.u32 %v4062_v11, %v3641_v13  ;;  %v3994_v0 = vld [vmem:[#allocation11 + $0x58c] sm:$0xf0]  ;;  %v3841_v34 = vld [vmem:[#allocation11 + $0xcc] sm:$0xf] }
 0x1cd   :  { %2244 = vmatpush.bf16.msra.mxu3 %v3428_v19  ;;  %v3095_v19 = vld [vmem:[#allocation11 + $0x368] sm:$0xf]  ;;  %v3868_v11 = vld [vmem:[#allocation11 + $0x19c] sm:$0xf0]  ;;  %v2761_v35 = vld [vmem:[#allocation11 + $0xe0] sm:$0xf0] }
 0x1ce   :  { %v3988_v13 = vld [vmem:[#allocation11 + $0x55c] sm:$0xf0] }
 0x1cf   :  { %2217 = vmatpush.bf16.msra.mxu0 %v3068_v24  ;;  %2230 = vmatpush.bf16.msra.mxu2 %v3260_v25  ;;  %v3617_v24 = vld [vmem:[#allocation11 + $0x798] sm:$0xf0]  ;;  %v2952_v25 = vor.u32 %v3892_v18, %v2951_v17  ;;  %v3791_v17 = vld [vmem:[#allocation11 + $0x8d8] sm:$0xf]  ;;  %v4102_v18 = vld [vmem:[#allocation11 + $0x8ec] sm:$0xf0] }
 0x1d0   :  { %2252 = vmatpush.bf16.msra.mxu1 %v3740_v29  ;;  %2245 = vmatmul.bf16.vlgmr.msra.gmra.mxu3 %v4456_v57  ;;  %v3096_v29 = vor.u32 %v3928_v20, %v3095_v19  ;;  %v3620_v36 = vor.u32 %v4056_v23, %v3617_v24  ;;  %v3847_v20 = vld [vmem:[#allocation11 + $0xfc] sm:$0xf]  ;;  %v4096_v32 = vld [vmem:[#allocation11 + $0x8bc] sm:$0xf0] }
 0x1d1   :  { %2289 = vmatpush.bf16.msrb.mxu3 %v3216_v22  ;;  %v2760_v22 = vor.u32 %v3844_v15, %v2759_v14  ;;  %v3599_v14 = vld [vmem:[#allocation11 + $0x758] sm:$0xf]  ;;  %v4036_v58 = vld [vmem:[#allocation11 + $0x6dc] sm:$0xf0] }
 0x1d3   :  { %2218 = vmatpush.bf16.msra.mxu0 %v3044_v41  ;;  %2231 = vmatpush.bf16.msra.mxu2 %v3236_v42  ;;  %v2711_v41 = vld [vmem:[#allocation11 + $0x68] sm:$0xf]  ;;  %v3832_v42 = vld [vmem:[#allocation11 + $0x7c] sm:$0xf0] }
 0x1d4   :  { %2253 = vmatpush.bf16.msra.mxu1 %v3716_v33  ;;  %v3880_v33 = vld [vmem:[#allocation11 + $0x1fc] sm:$0xf0]  ;;  %v2712_v49 = vor.u32 %v3832_v42, %v2711_v41  ;;  %v3551_v42 = vld [vmem:[#allocation11 + $0x6f8] sm:$0xf] }
 0x1d5   :  { %2290 = vmatpush.bf16.msrb.mxu3 %v3192_v37  ;;  %2206 = vmatmul.bf16.vlgmr.msrb.gmra.mxu1 %v4445_v3  ;;  %v2736_v37 = vor.u32 %v3838_v27, %v2735_v26  ;;  %v2904_v52 = vor.u32 %v3880_v33, %v2903_v43  ;;  %v3311_v26 = vld [vmem:[#allocation11 + $0x518] sm:$0xf]  ;;  %v3982_v27 = vld [vmem:[#allocation11 + $0x52c] sm:$0xf0]  ;;  %v3976_v41 = vld [vmem:[#allocation11 + $0x4fc] sm:$0xf0]  ;;  %v2764_v43 = vor.u32 %v3841_v34, %v2761_v35 }
 0x1d6   :  { %2219 = vmatmul.bf16.vlgmr.msra.gmra.mxu0 %v4440_v47  ;;  %2232 = vmatmul.bf16.vlgmr.msra.gmra.mxu2 %v4454_v56  ;;  %v3743_v33 = vld [vmem:[#allocation11 + $0x878] sm:$0xf] }
 0x1d7   :  { %2263 = vmatpush.bf16.msrb.mxu0 %v2832_v45  ;;  %2276 = vmatpush.bf16.msrb.mxu2 %v3024_v46  ;;  %v3383_v45 = vld [vmem:[#allocation11 + $0x5a8] sm:$0xf] }
 0x1d8   :  { %2254 = vmatpush.bf16.msra.mxu1 %v3692_v59  ;;  %v3047_v46 = vld [vmem:[#allocation11 + $0x308] sm:$0xf]  ;;  %v3384_v54 = vor.u32 %v4000_v39, %v3383_v45  ;;  %v2879_v59 = vld [vmem:[#allocation11 + $0x1b8] sm:$0xf]  ;;  %v4090_v45 = vld [vmem:[#allocation11 + $0x88c] sm:$0xf0] }
 0x1d9   :  { %2291 = vmatpush.bf16.msrb.mxu3 %v3168_v51  ;;  %v2833_v51 = vld [vmem:[#allocation11 + $0x170] sm:$0xf0]  ;;  %v2880_v7 = vor.u32 %v3874_v62, %v2879_v59  ;;  %v3835_v39 = vld [vmem:[#allocation11 + $0x9c] sm:$0xf]  ;;  %v3719_v59 = vld [vmem:[#allocation11 + $0x848] sm:$0xf] }
 0x1da   :  { %v2836_v53 = vor.u32 %v3859_v50, %v2833_v51  ;;  %v3744_v50 = vor.u32 %v4090_v45, %v3743_v33  ;;  %v3263_v51 = vld [vmem:[#allocation11 + $0x4b8] sm:$0xf]  ;;  %v3829_v62 = vld [vmem:[#allocation11 + $0x6c] sm:$0xf] }
 0x1db   :  { %2264 = vmatpush.bf16.msrb.mxu0 %v2808_v60  ;;  %2277 = vmatpush.bf16.msrb.mxu2 %v3000_v63  ;;  %v3048_v60 = vor.u32 %v3916_v48, %v3047_v46  ;;  %v3359_v63 = vld [vmem:[#allocation11 + $0x578] sm:$0xf]  ;;  %v2737_v46 = vld [vmem:[#allocation11 + $0xb0] sm:$0xf0] }
 0x1dc   :  { %2255 = vmatpush.bf16.msra.mxu1 %v3668_v9  ;;  %v3360_v8 = vor.u32 %v3994_v0, %v3359_v63  ;;  %v3820_v9 = vld [vmem:[#allocation11 + $0x1c] sm:$0xf0]  ;;  %v2740_v55 = vor.u32 %v3835_v39, %v2737_v46  ;;  %v2713_v63 = vld [vmem:[#allocation11 + $0x80] sm:$0xf0]  ;;  %v3431_v39 = vld [vmem:[#allocation11 + $0x608] sm:$0xf] }
 0x1dd   :  { %2292 = vmatpush.bf16.msrb.mxu3 %v3144_v4  ;;  %v3853_v4 = vld [vmem:[#allocation11 + $0x12c] sm:$0xf]  ;;  %v2664_v19 = vor.u32 %v3820_v9, %v2663_v6  ;;  %v3503_v6 = vld [vmem:[#allocation11 + $0x698] sm:$0xf]  ;;  %v4012_v46 = vld [vmem:[#allocation11 + $0x61c] sm:$0xf0] }
 0x1de   :  { %v2812_v15 = vor.u32 %v3853_v4, %v2809_v5  ;;  %v3964_v5 = vld [vmem:[#allocation11 + $0x49c] sm:$0xf0]  ;;  %v3695_v9 = vld [vmem:[#allocation11 + $0x818] sm:$0xf] }
 0x1df   :  { %2265 = vmatpush.bf16.msrb.mxu0 %v2784_v10  ;;  %2278 = vmatpush.bf16.msrb.mxu2 %v2976_v12  ;;  %v2855_v10 = vld [vmem:[#allocation11 + $0x188] sm:$0xf] }
 0x1e0   :  { %2256 = vmatpush.bf16.msra.mxu1 %v3644_v21  ;;  %v3335_v12 = vld [vmem:[#allocation11 + $0x548] sm:$0xf]  ;;  %v2785_v21 = vld [vmem:[#allocation11 + $0x110] sm:$0xf0] }
 0x1e1   :  { %2293 = vmatpush.bf16.msrb.mxu3 %v3120_v16  ;;  %v4054_v16 = vld [vmem:[#allocation11 + $0x76c] sm:$0xf0]  ;;  %v3336_v23 = vor.u32 %v3988_v13, %v3335_v12  ;;  %v3025_v12 = vld [vmem:[#allocation11 + $0x2f0] sm:$0xf0]  ;;  %v3823_v13 = vld [vmem:[#allocation11 + $0x3c] sm:$0xf] }
 0x1e2   :  { %v3600_v24 = vor.u32 %v4054_v16, %v3599_v14  ;;  %v2689_v14 = vld [vmem:[#allocation11 + $0x50] sm:$0xf0] }
 0x1e3   :  { %2266 = vmatpush.bf16.msrb.mxu0 %v2760_v22  ;;  %2279 = vmatpush.bf16.msrb.mxu2 %v2952_v25  ;;  %v2856_v22 = vor.u32 %v3868_v11, %v2855_v10  ;;  %v3792_v25 = vor.u32 %v4102_v18, %v3791_v17  ;;  %v4078_v10 = vld [vmem:[#allocation11 + $0x82c] sm:$0xf0]  ;;  %v3907_v11 = vld [vmem:[#allocation11 + $0x2dc] sm:$0xf]  ;;  %v3479_v18 = vld [vmem:[#allocation11 + $0x668] sm:$0xf] }
 0x1e4   :  { %2257 = vmatpush.bf16.msra.mxu1 %v3620_v36  ;;  %v3312_v36 = vor.u32 %v3982_v27, %v3311_v26  ;;  %v3696_v17 = vor.u32 %v4078_v10, %v3695_v9  ;;  %v3817_v26 = vld [vmem:[#allocation11 + $0xc] sm:$0xf]  ;;  %v2665_v27 = vld [vmem:[#allocation11 + $0x20] sm:$0xf0] }
 0x1e5   :  { %2294 = vmatpush.bf16.msrb.mxu3 %v3096_v29  ;;  %v2788_v29 = vor.u32 %v3847_v20, %v2785_v21  ;;  %v3028_v20 = vor.u32 %v3907_v11, %v3025_v12  ;;  %v2692_v21 = vor.u32 %v3823_v13, %v2689_v14  ;;  %v2668_v35 = vor.u32 %v3817_v26, %v2665_v27  ;;  %v3949_v9 = vld [vmem:[#allocation11 + $0x42c] sm:$0xf]  ;;  %v3193_v10 = vld [vmem:[#allocation11 + $0x440] sm:$0xf0]  ;;  %v3505_v26 = vld [vmem:[#allocation11 + $0x6b0] sm:$0xf0] }
 0x1e6   :  { %v3997_v11 = vld [vmem:[#allocation11 + $0x5ac] sm:$0xf]  ;;  %v3385_v12 = vld [vmem:[#allocation11 + $0x5c0] sm:$0xf0] }
 0x1e7   :  { %2267 = vmatpush.bf16.msrb.mxu0 %v2736_v37  ;;  %2280 = vmatpush.bf16.msrb.mxu2 %v2928_v38  ;;  %v3576_v37 = vor.u32 %v4048_v30, %v3575_v28  ;;  %v3768_v38 = vor.u32 %v4096_v32, %v3767_v31  ;;  %v4051_v28 = vld [vmem:[#allocation11 + $0x75c] sm:$0xf]  ;;  %v3455_v32 = vld [vmem:[#allocation11 + $0x638] sm:$0xf]  ;;  %v4033_v13 = vld [vmem:[#allocation11 + $0x6cc] sm:$0xf] }
 0x1e8   :  { %2302 = vmatpush.bf16.msrb.mxu1 %v3408_v40  ;;  %v3287_v40 = vld [vmem:[#allocation11 + $0x4e8] sm:$0xf]  ;;  %v3529_v14 = vld [vmem:[#allocation11 + $0x6e0] sm:$0xf0] }
 0x1e9   :  { %2295 = vmatpush.bf16.msrb.mxu3 %v3072_v44  ;;  %2258 = vmatmul.bf16.vlgmr.msra.gmra.mxu1 %v4458_v61  ;;  %v4042_v44 = vld [vmem:[#allocation11 + $0x70c] sm:$0xf0]  ;;  %v3288_v48 = vor.u32 %v3976_v41, %v3287_v40  ;;  %v3895_v41 = vld [vmem:[#allocation11 + $0x27c] sm:$0xf] }
 0x1eb   :  { %2268 = vmatpush.bf16.msrb.mxu0 %v2712_v49  ;;  %2281 = vmatpush.bf16.msrb.mxu2 %v2904_v52  ;;  %v3552_v49 = vor.u32 %v4042_v44, %v3551_v42  ;;  %v3970_v52 = vld [vmem:[#allocation11 + $0x4cc] sm:$0xf0]  ;;  %v2977_v42 = vld [vmem:[#allocation11 + $0x290] sm:$0xf0]  ;;  %v3577_v44 = vld [vmem:[#allocation11 + $0x740] sm:$0xf0] }
 0x1ec   :  { %2303 = vmatpush.bf16.msrb.mxu1 %v3384_v54  ;;  %v3527_v54 = vld [vmem:[#allocation11 + $0x6c8] sm:$0xf]  ;;  %v3264_v0 = vor.u32 %v3970_v52, %v3263_v51  ;;  %v3889_v51 = vld [vmem:[#allocation11 + $0x24c] sm:$0xf]  ;;  %v2953_v52 = vld [vmem:[#allocation11 + $0x260] sm:$0xf0] }
 0x1ed   :  { %2296 = vmatpush.bf16.msrb.mxu3 %v3048_v60  ;;  %v4084_v60 = vld [vmem:[#allocation11 + $0x85c] sm:$0xf0] }
 0x1ee   :  { %v3720_v4 = vor.u32 %v4084_v60, %v3719_v59  ;;  %v4003_v59 = vld [vmem:[#allocation11 + $0x5dc] sm:$0xf]  ;;  %v3409_v60 = vld [vmem:[#allocation11 + $0x5f0] sm:$0xf0] }
 0x1ef   :  { %2269 = vmatpush.bf16.msrb.mxu0 %v2688_v1  ;;  %2282 = vmatpush.bf16.msrb.mxu2 %v2880_v7  ;;  %v3528_v1 = vor.u32 %v4036_v58, %v3527_v54  ;;  %v4030_v7 = vld [vmem:[#allocation11 + $0x6ac] sm:$0xf0]  ;;  %v3217_v58 = vld [vmem:[#allocation11 + $0x470] sm:$0xf0] }
 0x1f0   :  { %2304 = vmatpush.bf16.msrb.mxu1 %v3360_v8  ;;  %2297 = vmatmul.bf16.vlgmr.msrb.gmra.mxu3 %v4440_v47  ;;  %v2716_v8 = vor.u32 %v3829_v62, %v2713_v63  ;;  %v3504_v16 = vor.u32 %v4030_v7, %v3503_v6  ;;  %v4039_v62 = vld [vmem:[#allocation11 + $0x6fc] sm:$0xf]  ;;  %v3553_v63 = vld [vmem:[#allocation11 + $0x710] sm:$0xf0]  ;;  %v3412_v7 = vor.u32 %v4003_v59, %v3409_v60 }
 0x1f1   :  { %2341 = vmatpush.bf16.msra.mxu3 %v2836_v53  ;;  %v3239_v53 = vld [vmem:[#allocation11 + $0x488] sm:$0xf]  ;;  %v2929_v6 = vld [vmem:[#allocation11 + $0x230] sm:$0xf0] }
 0x1f3   :  { %2270 = vmatpush.bf16.msrb.mxu0 %v2664_v19  ;;  %2283 = vmatpush.bf16.msrb.mxu2 %v2856_v22  ;;  %v4024_v19 = vld [vmem:[#allocation11 + $0x67c] sm:$0xf0]  ;;  %v3671_v22 = vld [vmem:[#allocation11 + $0x7e8] sm:$0xf] }
 0x1f4   :  { %2305 = vmatpush.bf16.msrb.mxu1 %v3336_v23  ;;  %v4072_v23 = vld [vmem:[#allocation11 + $0x7fc] sm:$0xf0]  ;;  %v3480_v30 = vor.u32 %v4024_v19, %v3479_v18  ;;  %v2905_v18 = vld [vmem:[#allocation11 + $0x200] sm:$0xf0]  ;;  %v3388_v19 = vor.u32 %v3997_v11, %v3385_v12 }
 0x1f5   :  { %2342 = vmatpush.bf16.msra.mxu3 %v2812_v15  ;;  %v3240_v15 = vor.u32 %v3964_v5, %v3239_v53  ;;  %v3672_v31 = vor.u32 %v4072_v23, %v3671_v22  ;;  %v3883_v5 = vld [vmem:[#allocation11 + $0x21c] sm:$0xf]  ;;  %v3169_v22 = vld [vmem:[#allocation11 + $0x410] sm:$0xf0] }
 0x1f6   :  { %2271 = vmatmul.bf16.vlgmr.msrb.gmra.mxu0 %v4443_v2  ;;  %2284 = vmatmul.bf16.vlgmr.msrb.gmra.mxu2 %v4445_v3  ;;  %v3991_v23 = vld [vmem:[#allocation11 + $0x57c] sm:$0xf] }
 0x1f7   :  { %2315 = vmatpush.bf16.msra.mxu0 %v3600_v24  ;;  %2328 = vmatpush.bf16.msra.mxu2 %v3792_v25  ;;  %v3901_v24 = vld [vmem:[#allocation11 + $0x2ac] sm:$0xf]  ;;  %v3001_v25 = vld [vmem:[#allocation11 + $0x2c0] sm:$0xf0] }
 0x1f8   :  { %2306 = vmatpush.bf16.msrb.mxu1 %v3312_v36  ;;  %v3004_v34 = vor.u32 %v3901_v24, %v3001_v25  ;;  %v4018_v36 = vld [vmem:[#allocation11 + $0x64c] sm:$0xf0]  ;;  %v3361_v24 = vld [vmem:[#allocation11 + $0x590] sm:$0xf0]  ;;  %v4027_v25 = vld [vmem:[#allocation11 + $0x69c] sm:$0xf] }
 0x1f9   :  { %2343 = vmatpush.bf16.msra.mxu3 %v2788_v29  ;;  %v3601_v29 = vld [vmem:[#allocation11 + $0x770] sm:$0xf0]  ;;  %v3456_v33 = vor.u32 %v4018_v36, %v3455_v32  ;;  %v3508_v32 = vor.u32 %v4027_v25, %v3505_v26  ;;  %v3985_v36 = vld [vmem:[#allocation11 + $0x54c] sm:$0xf] }
 0x1fa   :  { %v3604_v40 = vor.u32 %v4051_v28, %v3601_v29  ;;  %v3871_v29 = vld [vmem:[#allocation11 + $0x1bc] sm:$0xf] }
 0x1fb   :  { %2316 = vmatpush.bf16.msra.mxu0 %v3576_v37  ;;  %2329 = vmatpush.bf16.msra.mxu2 %v3768_v38  ;;  %v3647_v37 = vld [vmem:[#allocation11 + $0x7b8] sm:$0xf]  ;;  %v4066_v38 = vld [vmem:[#allocation11 + $0x7cc] sm:$0xf0] }
 0x1fc   :  { %2307 = vmatpush.bf16.msrb.mxu1 %v3288_v48  ;;  %v3648_v45 = vor.u32 %v4066_v38, %v3647_v37  ;;  %v3623_v48 = vld [vmem:[#allocation11 + $0x788] sm:$0xf]  ;;  %v3337_v37 = vld [vmem:[#allocation11 + $0x560] sm:$0xf0]  ;;  %v4021_v38 = vld [vmem:[#allocation11 + $0x66c] sm:$0xf] }
 0x1fd   :  { %2344 = vmatpush.bf16.msra.mxu3 %v2764_v43  ;;  %v4045_v43 = vld [vmem:[#allocation11 + $0x72c] sm:$0xf] }
 0x1fe   :  { %v3580_v54 = vor.u32 %v4045_v43, %v3577_v44  ;;  %v3865_v43 = vld [vmem:[#allocation11 + $0x18c] sm:$0xf]  ;;  %v2857_v44 = vld [vmem:[#allocation11 + $0x1a0] sm:$0xf0] }
 0x1ff   :  { %2317 = vmatpush.bf16.msra.mxu0 %v3552_v49  ;;  %2330 = vmatpush.bf16.msra.mxu2 %v3744_v50  ;;  %v2980_v49 = vor.u32 %v3895_v41, %v2977_v42  ;;  %v4060_v50 = vld [vmem:[#allocation11 + $0x79c] sm:$0xf0] }
 0x200   :  { %2308 = vmatpush.bf16.msrb.mxu1 %v3264_v0  ;;  %v3432_v0 = vor.u32 %v4012_v46, %v3431_v39  ;;  %v3624_v53 = vor.u32 %v4060_v50, %v3623_v48  ;;  %v3931_v39 = vld [vmem:[#allocation11 + $0x39c] sm:$0xf]  ;;  %v3121_v46 = vld [vmem:[#allocation11 + $0x3b0] sm:$0xf0] }
 0x201   :  { %2345 = vmatpush.bf16.msra.mxu3 %v2740_v55  ;;  %v3955_v55 = vld [vmem:[#allocation11 + $0x45c] sm:$0xf] }
 0x202   :  { %v3979_v48 = vld [vmem:[#allocation11 + $0x51c] sm:$0xf] }
 0x203   :  { %2318 = vmatpush.bf16.msra.mxu0 %v3528_v1  ;;  %2331 = vmatpush.bf16.msra.mxu2 %v3720_v4  ;;  %v2956_v1 = vor.u32 %v3889_v51, %v2953_v52  ;;  %v3220_v4 = vor.u32 %v3955_v55, %v3217_v58  ;;  %v4099_v50 = vld [vmem:[#allocation11 + $0x8dc] sm:$0xf]  ;;  %v3793_v51 = vld [vmem:[#allocation11 + $0x8f0] sm:$0xf0]  ;;  %v2860_v55 = vor.u32 %v3865_v43, %v2857_v44 }
 0x204   :  { %2309 = vmatpush.bf16.msrb.mxu1 %v3240_v15  ;;  %v2932_v15 = vor.u32 %v3883_v5, %v2929_v6  ;;  %v4015_v52 = vld [vmem:[#allocation11 + $0x63c] sm:$0xf]  ;;  %v3124_v58 = vor.u32 %v3931_v39, %v3121_v46  ;;  %v3796_v60 = vor.u32 %v4099_v50, %v3793_v51  ;;  %v3769_v5 = vld [vmem:[#allocation11 + $0x8c0] sm:$0xf0]  ;;  %v4009_v6 = vld [vmem:[#allocation11 + $0x60c] sm:$0xf] }
 0x205   :  { %2346 = vmatpush.bf16.msra.mxu3 %v2716_v8  ;;  %v3556_v8 = vor.u32 %v4039_v62, %v3553_v63  ;;  %v3925_v62 = vld [vmem:[#allocation11 + $0x36c] sm:$0xf]  ;;  %v3097_v63 = vld [vmem:[#allocation11 + $0x380] sm:$0xf0]  ;;  %v3697_v39 = vld [vmem:[#allocation11 + $0x830] sm:$0xf0] }
 0x206   :  { %v2815_v46 = vld [vmem:[#allocation11 + $0x130] sm:$0xf]  ;;  %v3905_v51 = vld [vmem:[#allocation11 + $0x2c4] sm:$0xf0] }
 0x207   :  { %2319 = vmatpush.bf16.msra.mxu0 %v3504_v16  ;;  %2332 = vmatpush.bf16.msra.mxu2 %v3696_v17  ;;  %v3196_v16 = vor.u32 %v3949_v9, %v3193_v10  ;;  %v3877_v17 = vld [vmem:[#allocation11 + $0x1ec] sm:$0xf]  ;;  %v3223_v9 = vld [vmem:[#allocation11 + $0x460] sm:$0xf]  ;;  %v3959_v10 = vld [vmem:[#allocation11 + $0x474] sm:$0xf0] }
 0x208   :  { %2354 = vmatpush.bf16.msra.mxu1 %v3028_v20  ;;  %v3532_v20 = vor.u32 %v4033_v13, %v3529_v14  ;;  %v2908_v27 = vor.u32 %v3877_v17, %v2905_v18  ;;  %v3919_v13 = vld [vmem:[#allocation11 + $0x33c] sm:$0xf]  ;;  %v3073_v14 = vld [vmem:[#allocation11 + $0x350] sm:$0xf0]  ;;  %v3007_v50 = vld [vmem:[#allocation11 + $0x2b0] sm:$0xf] }
 0x209   :  { %2347 = vmatpush.bf16.msra.mxu3 %v2692_v21  ;;  %2310 = vmatmul.bf16.vlgmr.msrb.gmra.mxu1 %v4454_v56  ;;  %v3943_v21 = vld [vmem:[#allocation11 + $0x3fc] sm:$0xf]  ;;  %v3265_v17 = vld [vmem:[#allocation11 + $0x4d0] sm:$0xf0] }
 0x20a   :  { %v3172_v28 = vor.u32 %v3943_v21, %v3169_v22  ;;  %v4087_v18 = vld [vmem:[#allocation11 + $0x87c] sm:$0xf]  ;;  %v3076_v21 = vor.u32 %v3919_v13, %v3073_v14  ;;  %v3199_v22 = vld [vmem:[#allocation11 + $0x430] sm:$0xf] }
 0x20b   :  { %2320 = vmatpush.bf16.msra.mxu0 %v3480_v30  ;;  %2333 = vmatpush.bf16.msra.mxu2 %v3672_v31  ;;  %v2881_v30 = vld [vmem:[#allocation11 + $0x1d0] sm:$0xf0]  ;;  %v3364_v31 = vor.u32 %v3991_v23, %v3361_v24  ;;  %v3953_v23 = vld [vmem:[#allocation11 + $0x444] sm:$0xf0]  ;;  %v3913_v24 = vld [vmem:[#allocation11 + $0x30c] sm:$0xf] }
 0x20c   :  { %2355 = vmatpush.bf16.msra.mxu1 %v3004_v34  ;;  %v3937_v34 = vld [vmem:[#allocation11 + $0x3cc] sm:$0xf]  ;;  %v2884_v41 = vor.u32 %v3871_v29, %v2881_v30  ;;  %v3241_v29 = vld [vmem:[#allocation11 + $0x4a0] sm:$0xf0] }
 0x20d   :  { %2348 = vmatpush.bf16.msra.mxu3 %v2668_v35  ;;  %v3145_v35 = vld [vmem:[#allocation11 + $0x3e0] sm:$0xf0]  ;;  %v4081_v30 = vld [vmem:[#allocation11 + $0x84c] sm:$0xf] }
 0x20e   :  { %v3148_v42 = vor.u32 %v3937_v34, %v3145_v35  ;;  %v3200_v34 = vor.u32 %v3953_v23, %v3199_v22  ;;  %v3863_v35 = vld [vmem:[#allocation11 + $0x174] sm:$0xf0]  ;;  %v4057_v23 = vld [vmem:[#allocation11 + $0x78c] sm:$0xf] }
 0x20f   :  { %2321 = vmatpush.bf16.msra.mxu0 %v3456_v33  ;;  %2334 = vmatpush.bf16.msra.mxu2 %v3648_v45  ;;  %v3340_v33 = vor.u32 %v3985_v36, %v3337_v37  ;;  %v3031_v36 = vld [vmem:[#allocation11 + $0x2e0] sm:$0xf]  ;;  %v3911_v37 = vld [vmem:[#allocation11 + $0x2f4] sm:$0xf0] }
 0x210   :  { %2356 = vmatpush.bf16.msra.mxu1 %v2980_v49  ;;  %2349 = vmatmul.bf16.vlgmr.msra.gmra.mxu3 %v4443_v2  ;;  %v3313_v49 = vld [vmem:[#allocation11 + $0x530] sm:$0xf0] }
 0x211   :  { %2393 = vmatpush.bf16.msrb.mxu3 %v3604_v40  ;;  %v3481_v40 = vld [vmem:[#allocation11 + $0x680] sm:$0xf0]  ;;  %v3316_v59 = vor.u32 %v3979_v48, %v3313_v49  ;;  %v3857_v49 = vld [vmem:[#allocation11 + $0x144] sm:$0xf0] }
 0x212   :  { %v3484_v45 = vor.u32 %v4021_v38, %v3481_v40  ;;  %v3175_v40 = vld [vmem:[#allocation11 + $0x400] sm:$0xf] }
 0x213   :  { %2322 = vmatpush.bf16.msra.mxu0 %v3432_v0  ;;  %2335 = vmatpush.bf16.msra.mxu2 %v3624_v53  ;;  %v3973_v0 = vld [vmem:[#allocation11 + $0x4ec] sm:$0xf] }
 0x214   :  { %2357 = vmatpush.bf16.msra.mxu1 %v2956_v1  ;;  %v3289_v1 = vld [vmem:[#allocation11 + $0x500] sm:$0xf0] }
 0x215   :  { %2394 = vmatpush.bf16.msrb.mxu3 %v3580_v54  ;;  %v3457_v54 = vld [vmem:[#allocation11 + $0x650] sm:$0xf0]  ;;  %v3292_v11 = vor.u32 %v3973_v0, %v3289_v1  ;;  %v2983_v1 = vld [vmem:[#allocation11 + $0x280] sm:$0xf] }
 0x216   :  { %2323 = vmatmul.bf16.vlgmr.msra.gmra.mxu0 %v4456_v57  ;;  %2336 = vmatmul.bf16.vlgmr.msra.gmra.mxu2 %v4458_v61  ;;  %v3460_v53 = vor.u32 %v4015_v52, %v3457_v54  ;;  %v3151_v52 = vld [vmem:[#allocation11 + $0x3d0] sm:$0xf]  ;;  %v3941_v54 = vld [vmem:[#allocation11 + $0x3e4] sm:$0xf0] }
 0x217   :  { %2367 = vmatpush.bf16.msrb.mxu0 %v3220_v4  ;;  %2380 = vmatpush.bf16.msrb.mxu2 %v3412_v7  ;;  %v4093_v4 = vld [vmem:[#allocation11 + $0x8ac] sm:$0xf]  ;;  %v3433_v7 = vld [vmem:[#allocation11 + $0x620] sm:$0xf0]  ;;  %v3152_v0 = vor.u32 %v3941_v54, %v3151_v52  ;;  %v3055_v52 = vld [vmem:[#allocation11 + $0x310] sm:$0xf] }
 0x218   :  { %2358 = vmatpush.bf16.msra.mxu1 %v2932_v15  ;;  %v3772_v12 = vor.u32 %v4093_v4, %v3769_v5  ;;  %v3967_v15 = vld [vmem:[#allocation11 + $0x4bc] sm:$0xf]  ;;  %v3899_v4 = vld [vmem:[#allocation11 + $0x294] sm:$0xf0]  ;;  %v3127_v5 = vld [vmem:[#allocation11 + $0x3a0] sm:$0xf] }
 0x219   :  { %2395 = vmatpush.bf16.msrb.mxu3 %v3556_v8  ;;  %v3100_v8 = vor.u32 %v3925_v62, %v3097_v63  ;;  %v3268_v25 = vor.u32 %v3967_v15, %v3265_v17  ;;  %v3673_v62 = vld [vmem:[#allocation11 + $0x800] sm:$0xf0]  ;;  %v2791_v63 = vld [vmem:[#allocation11 + $0x100] sm:$0xf]  ;;  %v3845_v15 = vld [vmem:[#allocation11 + $0xe4] sm:$0xf0] }
 0x21a   :  { %v3893_v17 = vld [vmem:[#allocation11 + $0x264] sm:$0xf0] }
 0x21b   :  { %2368 = vmatpush.bf16.msrb.mxu0 %v3196_v16  ;;  %2381 = vmatpush.bf16.msrb.mxu2 %v3388_v19  ;;  %v3436_v16 = vor.u32 %v4009_v6, %v3433_v7  ;;  %v3745_v19 = vld [vmem:[#allocation11 + $0x890] sm:$0xf0]  ;;  %v3935_v6 = vld [vmem:[#allocation11 + $0x3b4] sm:$0xf0]  ;;  %v3917_v54 = vld [vmem:[#allocation11 + $0x324] sm:$0xf0] }
 0x21c   :  { %2359 = vmatpush.bf16.msra.mxu1 %v2908_v27  ;;  %v3748_v26 = vor.u32 %v4087_v18, %v3745_v19  ;;  %v3049_v27 = vld [vmem:[#allocation11 + $0x320] sm:$0xf0]  ;;  %v3128_v14 = vor.u32 %v3935_v6, %v3127_v5  ;;  %v3103_v19 = vld [vmem:[#allocation11 + $0x370] sm:$0xf]  ;;  %v2887_v5 = vld [vmem:[#allocation11 + $0x1c0] sm:$0xf] }
 0x21d   :  { %2396 = vmatpush.bf16.msrb.mxu3 %v3532_v20  ;;  %v3224_v20 = vor.u32 %v3959_v10, %v3223_v9  ;;  %v3052_v38 = vor.u32 %v3913_v24, %v3049_v27  ;;  %v2984_v9 = vor.u32 %v3899_v4, %v2983_v1  ;;  %v4063_v10 = vld [vmem:[#allocation11 + $0x7bc] sm:$0xf]  ;;  %v2743_v27 = vld [vmem:[#allocation11 + $0xa0] sm:$0xf]  ;;  %v3056_v1 = vor.u32 %v3917_v54, %v3055_v52  ;;  %v3827_v4 = vld [vmem:[#allocation11 + $0x54] sm:$0xf0] }
 0x21e   :  { %v3875_v6 = vld [vmem:[#allocation11 + $0x1d4] sm:$0xf0] }
 0x21f   :  { %2369 = vmatpush.bf16.msrb.mxu0 %v3172_v28  ;;  %2382 = vmatpush.bf16.msrb.mxu2 %v3364_v31  ;;  %v3961_v28 = vld [vmem:[#allocation11 + $0x48c] sm:$0xf]  ;;  %v3721_v31 = vld [vmem:[#allocation11 + $0x860] sm:$0xf0] }
 0x220   :  { %2360 = vmatpush.bf16.msra.mxu1 %v2884_v41  ;;  %v3947_v41 = vld [vmem:[#allocation11 + $0x414] sm:$0xf0]  ;;  %v3724_v43 = vor.u32 %v4081_v30, %v3721_v31  ;;  %v2935_v30 = vld [vmem:[#allocation11 + $0x220] sm:$0xf] }
 0x221   :  { %2397 = vmatpush.bf16.msrb.mxu3 %v3508_v32  ;;  %v2839_v32 = vld [vmem:[#allocation11 + $0x160] sm:$0xf]  ;;  %v3176_v48 = vor.u32 %v3947_v41, %v3175_v40  ;;  %v3887_v31 = vld [vmem:[#allocation11 + $0x234] sm:$0xf0] }
 0x222   :  { %v2840_v44 = vor.u32 %v3863_v35, %v2839_v32  ;;  %v3415_v32 = vld [vmem:[#allocation11 + $0x5e0] sm:$0xf] }
 0x223   :  { %2370 = vmatpush.bf16.msrb.mxu0 %v3148_v42  ;;  %2383 = vmatpush.bf16.msrb.mxu2 %v3340_v33  ;;  %v3244_v42 = vor.u32 %v3961_v28, %v3241_v29  ;;  %v3032_v33 = vor.u32 %v3911_v37, %v3031_v36  ;;  %v3839_v28 = vld [vmem:[#allocation11 + $0xb4] sm:$0xf0]  ;;  %v3079_v35 = vld [vmem:[#allocation11 + $0x340] sm:$0xf] }
 0x224   :  { %2361 = vmatpush.bf16.msra.mxu1 %v2860_v55  ;;  %v3923_v36 = vld [vmem:[#allocation11 + $0x354] sm:$0xf0]  ;;  %v2744_v41 = vor.u32 %v3839_v28, %v2743_v27 }
 0x225   :  { %2398 = vmatpush.bf16.msrb.mxu3 %v3484_v45  ;;  %v4075_v45 = vld [vmem:[#allocation11 + $0x81c] sm:$0xf] }
 0x226   :  { %v3700_v55 = vor.u32 %v4075_v45, %v3697_v39  ;;  %v3080_v39 = vor.u32 %v3923_v36, %v3079_v35  ;;  %v3848_v35 = vld [vmem:[#allocation11 + $0x104] sm:$0xf]  ;;  %v2793_v36 = vld [vmem:[#allocation11 + $0x118] sm:$0xf0] }
 0x227   :  { %2371 = vmatpush.bf16.msrb.mxu0 %v3124_v58  ;;  %2384 = vmatpush.bf16.msrb.mxu2 %v3316_v59  ;;  %v2816_v58 = vor.u32 %v3857_v49, %v2815_v46  ;;  %v3008_v59 = vor.u32 %v3905_v51, %v3007_v50  ;;  %v2911_v46 = vld [vmem:[#allocation11 + $0x1f0] sm:$0xf]  ;;  %v4001_v51 = vld [vmem:[#allocation11 + $0x5c4] sm:$0xf0] }
 0x228   :  { %2406 = vmatpush.bf16.msrb.mxu1 %v3796_v60  ;;  %v4069_v60 = vld [vmem:[#allocation11 + $0x7ec] sm:$0xf]  ;;  %v3391_v49 = vld [vmem:[#allocation11 + $0x5b0] sm:$0xf] }
 0x229   :  { %2399 = vmatpush.bf16.msrb.mxu3 %v3460_v53  ;;  %2362 = vmatmul.bf16.vlgmr.msra.gmra.mxu1 %v4445_v3  ;;  %v3851_v53 = vld [vmem:[#allocation11 + $0x114] sm:$0xf0]  ;;  %v3676_v7 = vor.u32 %v4069_v60, %v3673_v62 }
 0x22b   :  { %2372 = vmatpush.bf16.msrb.mxu0 %v3100_v8  ;;  %2385 = vmatpush.bf16.msrb.mxu2 %v3292_v11  ;;  %v2792_v8 = vor.u32 %v3851_v53, %v2791_v63  ;;  %v3649_v11 = vld [vmem:[#allocation11 + $0x7d0] sm:$0xf0]  ;;  %v2695_v63 = vld [vmem:[#allocation11 + $0x40] sm:$0xf]  ;;  %v3392_v53 = vor.u32 %v4001_v51, %v3391_v49 }
 0x22c   :  { %2407 = vmatpush.bf16.msrb.mxu1 %v3772_v12  ;;  %v2767_v12 = vld [vmem:[#allocation11 + $0xd0] sm:$0xf]  ;;  %v3652_v22 = vor.u32 %v4063_v10, %v3649_v11  ;;  %v3854_v10 = vld [vmem:[#allocation11 + $0x134] sm:$0xf]  ;;  %v2817_v11 = vld [vmem:[#allocation11 + $0x148] sm:$0xf0] }
 0x22d   :  { %2400 = vmatpush.bf16.msrb.mxu3 %v3436_v16  ;;  %v2959_v16 = vld [vmem:[#allocation11 + $0x250] sm:$0xf]  ;;  %v2768_v24 = vor.u32 %v3845_v15, %v2767_v12  ;;  %v2820_v28 = vor.u32 %v3854_v10, %v2817_v11  ;;  %v3842_v49 = vld [vmem:[#allocation11 + $0xd4] sm:$0xf]  ;;  %v3271_v11 = vld [vmem:[#allocation11 + $0x4c0] sm:$0xf] }
 0x22e   :  { %v2671_v15 = vld [vmem:[#allocation11 + $0x10] sm:$0xf] }
 0x22f   :  { %2373 = vmatpush.bf16.msrb.mxu0 %v3076_v21  ;;  %2386 = vmatpush.bf16.msrb.mxu2 %v3268_v25  ;;  %v4481_v21 = vld [vmem:[#allocation13] sm:$0x3f]  ;;  %v2960_v25 = vor.u32 %v3893_v17, %v2959_v16  ;;  %v3821_v16 = vld [vmem:[#allocation11 + $0x24] sm:$0xf0]  ;;  %v2863_v17 = vld [vmem:[#allocation11 + $0x190] sm:$0xf] }
 0x230   :  { %2408 = vmatpush.bf16.msrb.mxu1 %v3748_v26  ;;  %2401 = vmatmul.bf16.vlgmr.msrb.gmra.mxu3 %v4456_v57  ;;  %v3625_v26 = vld [vmem:[#allocation11 + $0x7a0] sm:$0xf0]  ;;  %v655_v37 = vperm.slane %v4481_v21, 0 }
 0x231   :  { %2445 = vmatpush.bf16.msra.mxu3 %v3224_v20  ;;  %v3929_v20 = vld [vmem:[#allocation11 + $0x384] sm:$0xf0] }
 0x232   :  { %v2116_v13 = vpop.f32.mrf.mxu0  ;;  %v3104_v29 = vor.u32 %v3929_v20, %v3103_v19 }
 0x233   :  { %2374 = vmatpush.bf16.msrb.mxu0 %v3052_v38  ;;  %2387 = vmatpush.bf16.msrb.mxu2 %v3244_v42  ;;  %v4479_v18 = vpop.f32.mrf.mxu3  ;;  %v3628_v38 = vor.u32 %v4057_v23, %v3625_v26  ;;  %v2936_v42 = vor.u32 %v3887_v31, %v2935_v30  ;;  %v3869_v23 = vld [vmem:[#allocation11 + $0x1a4] sm:$0xf0]  ;;  %v4055_v30 = vld [vmem:[#allocation11 + $0x774] sm:$0xf0]  ;;  %v3799_v31 = vld [vmem:[#allocation11 + $0x8e0] sm:$0xf] }
 0x234   :  { %2409 = vmatpush.bf16.msrb.mxu1 %v3724_v43  ;;  %v2719_v43 = vld [vmem:[#allocation11 + $0x70] sm:$0xf] }
 0x235   :  { %2446 = vmatpush.bf16.msra.mxu3 %v3200_v34  ;;  %v4007_v34 = vld [vmem:[#allocation11 + $0x5f4] sm:$0xf0] }
 0x236   :  { %2375 = vmatmul.bf16.vlgmr.msrb.gmra.mxu0 %v4440_v47  ;;  %2388 = vmatmul.bf16.vlgmr.msrb.gmra.mxu2 %v4454_v56 }
 0x237   :  { %2419 = vmatpush.bf16.msra.mxu0 %v2840_v44  ;;  %2432 = vmatpush.bf16.msra.mxu2 %v3032_v33  ;;  %v3833_v44 = vld [vmem:[#allocation11 + $0x84] sm:$0xf0]  ;;  %v3416_v33 = vor.u32 %v4007_v34, %v3415_v32  ;;  %v4103_v34 = vld [vmem:[#allocation11 + $0x8f4] sm:$0xf0] }
 0x238   :  { %2410 = vmatpush.bf16.msrb.mxu1 %v3700_v55  ;;  %v2117_v55 = vadd.f32 %v2116_v13, %v655_v37  ;;  %v2720_v60 = vor.u32 %v3833_v44, %v2719_v43  ;;  %v2696_v13 = vor.u32 %v3827_v4, %v2695_v63  ;;  %v2672_v37 = vor.u32 %v3821_v16, %v2671_v15  ;;  %v4043_v4 = vld [vmem:[#allocation11 + $0x714] sm:$0xf0]  ;;  %v3535_v15 = vld [vmem:[#allocation11 + $0x6d0] sm:$0xf]  ;;  %v4037_v16 = vld [vmem:[#allocation11 + $0x6e4] sm:$0xf0] }
 0x239   :  { %2447 = vmatpush.bf16.msra.mxu3 %v3176_v48  ;;  %v2129_v40 = vpop.f32.mrf.mxu2  ;;  %v3881_v48 = vld [vmem:[#allocation11 + $0x204] sm:$0xf0]  ;;  %v3800_v43 = vor.u32 %v4103_v34, %v3799_v31  ;;  %v2796_v44 = vor.u32 %v3848_v35, %v2793_v36  ;;  %v3511_v36 = vld [vmem:[#allocation11 + $0x6a0] sm:$0xf] }
 0x23a   :  { %v2118_v45 = vpop.f32.mrf.mxu0  ;;  %v2912_v62 = vor.u32 %v3881_v48, %v2911_v46  ;;  %v4097_v48 = vld [vmem:[#allocation11 + $0x8c4] sm:$0xf0] }
 0x23b   :  { %2420 = vmatpush.bf16.msra.mxu0 %v2816_v58  ;;  %2433 = vmatpush.bf16.msra.mxu2 %v3008_v59  ;;  %v2144_v50 = vpop.f32.mrf.mxu3  ;;  %v3860_v58 = vld [vmem:[#allocation11 + $0x164] sm:$0xf]  ;;  %v2841_v59 = vld [vmem:[#allocation11 + $0x178] sm:$0xf0]  ;;  %v4049_v45 = vld [vmem:[#allocation11 + $0x744] sm:$0xf0] }
 0x23c   :  { %2411 = vmatpush.bf16.msrb.mxu1 %v3676_v7  ;;  %v2844_v7 = vor.u32 %v3860_v58, %v2841_v59  ;;  %v2769_v50 = vld [vmem:[#allocation11 + $0xe8] sm:$0xf0]  ;;  %v3295_v59 = vld [vmem:[#allocation11 + $0x4f0] sm:$0xf] }
 0x23d   :  { %2448 = vmatpush.bf16.msra.mxu3 %v3152_v0  ;;  %v2130_v0 = vadd.f32 %v2129_v40, %v2117_v55 }
 0x23f   :  { %2421 = vmatpush.bf16.msra.mxu0 %v2792_v8  ;;  %2434 = vmatpush.bf16.msra.mxu2 %v2984_v9  ;;  %v3367_v8 = vld [vmem:[#allocation11 + $0x580] sm:$0xf]  ;;  %v3995_v9 = vld [vmem:[#allocation11 + $0x594] sm:$0xf0]  ;;  %v2143_v20 = vadd.f32 %v4479_v18, %v2130_v0  ;;  %v2864_v18 = vor.u32 %v3869_v23, %v2863_v17  ;;  %v3727_v17 = vld [vmem:[#allocation11 + $0x850] sm:$0xf] }
 0x240   :  { %2412 = vmatpush.bf16.msrb.mxu1 %v3652_v22  ;;  %v3368_v19 = vor.u32 %v3995_v9, %v3367_v8  ;;  %v2745_v8 = vld [vmem:[#allocation11 + $0xb8] sm:$0xf0] }
 0x241   :  { %2449 = vmatpush.bf16.msra.mxu3 %v3128_v14  ;;  %v2131_v12 = vpop.f32.mrf.mxu2  ;;  %v2888_v14 = vor.u32 %v3875_v6, %v2887_v5  ;;  %v3751_v5 = vld [vmem:[#allocation11 + $0x880] sm:$0xf]  ;;  %v4091_v6 = vld [vmem:[#allocation11 + $0x894] sm:$0xf0] }
 0x242   :  { %v2155_v22 = vpop.f32.mrf.mxu1  ;;  %v3971_v12 = vld [vmem:[#allocation11 + $0x4d4] sm:$0xf0] }
 0x243   :  { %2422 = vmatpush.bf16.msra.mxu0 %v2768_v24  ;;  %2435 = vmatpush.bf16.msra.mxu2 %v2960_v25  ;;  %v3343_v24 = vld [vmem:[#allocation11 + $0x550] sm:$0xf]  ;;  %v3989_v25 = vld [vmem:[#allocation11 + $0x564] sm:$0xf0]  ;;  %v2168_v26 = vpop.f32.mrf.mxu0  ;;  %v4486_v27 = vpop.f32.mrf.mxu3  ;;  %v2156_v32 = vadd.f32 %v2155_v22, %v2143_v20  ;;  %v3830_v20 = vld [vmem:[#allocation11 + $0x74] sm:$0xf] }
 0x244   :  { %2413 = vmatpush.bf16.msrb.mxu1 %v3628_v38  ;;  %v3344_v38 = vor.u32 %v3989_v25, %v3343_v24  ;;  %v2721_v22 = vld [vmem:[#allocation11 + $0x88] sm:$0xf0]  ;;  %v656_v24 = vperm.slane %v4481_v21, 1  ;;  %v3272_v25 = vor.u32 %v3971_v12, %v3271_v11  ;;  %v4067_v11 = vld [vmem:[#allocation11 + $0x7d4] sm:$0xf0] }
 0x245   :  { %2450 = vmatpush.bf16.msra.mxu3 %v3104_v29  ;;  %v3607_v29 = vld [vmem:[#allocation11 + $0x760] sm:$0xf]  ;;  %v2169_v46 = vadd.f32 %v2168_v26, %v2156_v32  ;;  %v2724_v35 = vor.u32 %v3830_v20, %v2721_v22  ;;  %v3896_v12 = vld [vmem:[#allocation11 + $0x284] sm:$0xf]  ;;  %v3439_v20 = vld [vmem:[#allocation11 + $0x610] sm:$0xf] }
 0x246   :  { %v3608_v40 = vor.u32 %v4055_v30, %v3607_v29  ;;  %v3247_v29 = vld [vmem:[#allocation11 + $0x490] sm:$0xf]  ;;  %v3965_v30 = vld [vmem:[#allocation11 + $0x4a4] sm:$0xf0] }
 0x247   :  { %2423 = vmatpush.bf16.msra.mxu0 %v2744_v41  ;;  %2436 = vmatpush.bf16.msra.mxu2 %v2936_v42  ;;  %v3319_v41 = vld [vmem:[#allocation11 + $0x520] sm:$0xf]  ;;  %v3983_v42 = vld [vmem:[#allocation11 + $0x534] sm:$0xf0] }
 0x248   :  { %2458 = vmatpush.bf16.msra.mxu1 %v3416_v33  ;;  %v3583_v33 = vld [vmem:[#allocation11 + $0x730] sm:$0xf]  ;;  %v3320_v54 = vor.u32 %v3983_v42, %v3319_v41  ;;  %v3033_v41 = vld [vmem:[#allocation11 + $0x2f8] sm:$0xf0]  ;;  %v3824_v42 = vld [vmem:[#allocation11 + $0x44] sm:$0xf] }
 0x249   :  { %2451 = vmatpush.bf16.msra.mxu3 %v3080_v39  ;;  %2414 = vmatmul.bf16.vlgmr.msrb.gmra.mxu1 %v4458_v61  ;;  %v3775_v39 = vld [vmem:[#allocation11 + $0x8b0] sm:$0xf]  ;;  %v2181_v51 = vpop.f32.mrf.mxu2  ;;  %v3584_v58 = vor.u32 %v4049_v45, %v3583_v33  ;;  %v2195_v45 = vadd.f32 %v4486_v27, %v656_v24  ;;  %v4052_v27 = vld [vmem:[#allocation11 + $0x764] sm:$0xf] }
 0x24a   :  { %v2182_v52 = vadd.f32 %v2181_v51, %v2169_v46  ;;  %v2157_v55 = vpop.f32.mrf.mxu1 }
 0x24b   :  { %2424 = vmatpush.bf16.msra.mxu0 %v2720_v60  ;;  %2437 = vmatpush.bf16.msra.mxu2 %v2912_v62  ;;  %v3977_v60 = vld [vmem:[#allocation11 + $0x504] sm:$0xf0]  ;;  %v3559_v62 = vld [vmem:[#allocation11 + $0x700] sm:$0xf]  ;;  %v2170_v63 = vpop.f32.mrf.mxu0  ;;  %v2196_v0 = vpop.f32.mrf.mxu3  ;;  %v3009_v55 = vld [vmem:[#allocation11 + $0x2c8] sm:$0xf0] }
 0x24c   :  { %2459 = vmatpush.bf16.msra.mxu1 %v3392_v53  ;;  %v3776_v53 = vor.u32 %v4097_v48, %v3775_v39  ;;  %2575 = vst [vmem:[#allocation14] sm:$0xff] %v2182_v52  ;;  %v3296_v9 = vor.u32 %v3977_v60, %v3295_v59  ;;  %v3560_v10 = vor.u32 %v4043_v4, %v3559_v62  ;;  %v3487_v48 = vld [vmem:[#allocation11 + $0x670] sm:$0xf]  ;;  %v4073_v52 = vld [vmem:[#allocation11 + $0x804] sm:$0xf0] }
 0x24d   :  { %2452 = vmatpush.bf16.msra.mxu3 %v3056_v1  ;;  %v2772_v1 = vor.u32 %v3842_v49, %v2769_v50  ;;  %v4025_v49 = vld [vmem:[#allocation11 + $0x684] sm:$0xf0]  ;;  %v3679_v50 = vld [vmem:[#allocation11 + $0x7f0] sm:$0xf]  ;;  %v3818_v59 = vld [vmem:[#allocation11 + $0x14] sm:$0xf] }
 0x24e   :  { %v2673_v60 = vld [vmem:[#allocation11 + $0x28] sm:$0xf0]  ;;  %v3488_v0 = vor.u32 %v4025_v49, %v3487_v48  ;;  %v2937_v48 = vld [vmem:[#allocation11 + $0x238] sm:$0xf0]  ;;  %v3950_v49 = vld [vmem:[#allocation11 + $0x434] sm:$0xf] }
 0x24f   :  { %2425 = vmatpush.bf16.msra.mxu0 %v2696_v13  ;;  %2438 = vmatpush.bf16.msra.mxu2 %v2888_v14  ;;  %v3752_v13 = vor.u32 %v4091_v6, %v3751_v5  ;;  %v3680_v5 = vor.u32 %v4073_v52, %v3679_v50  ;;  %v3201_v52 = vld [vmem:[#allocation11 + $0x448] sm:$0xf0] }
 0x250   :  { %2460 = vmatpush.bf16.msra.mxu1 %v3368_v19  ;;  %2453 = vmatmul.bf16.vlgmr.msra.gmra.mxu3 %v4440_v47  ;;  %v4085_v19 = vld [vmem:[#allocation11 + $0x864] sm:$0xf0] }
 0x251   :  { %2497 = vmatpush.bf16.msrb.mxu3 %v2844_v7  ;;  %v3836_v7 = vld [vmem:[#allocation11 + $0xa4] sm:$0xf]  ;;  %v2183_v23 = vpop.f32.mrf.mxu2  ;;  %v3728_v34 = vor.u32 %v4085_v19, %v3727_v17  ;;  %v4046_v17 = vld [vmem:[#allocation11 + $0x734] sm:$0xf]  ;;  %v3585_v19 = vld [vmem:[#allocation11 + $0x748] sm:$0xf0] }
 0x252   :  { %v2748_v14 = vor.u32 %v3836_v7, %v2745_v8  ;;  %v2207_v26 = vpop.f32.mrf.mxu1  ;;  %v3463_v7 = vld [vmem:[#allocation11 + $0x640] sm:$0xf]  ;;  %v4019_v8 = vld [vmem:[#allocation11 + $0x654] sm:$0xf0] }
 0x253   :  { %2426 = vmatpush.bf16.msra.mxu0 %v2672_v37  ;;  %2439 = vmatpush.bf16.msra.mxu2 %v2864_v18  ;;  %v2220_v31 = vpop.f32.mrf.mxu0  ;;  %v4492_v32 = vpop.f32.mrf.mxu3  ;;  %v4031_v37 = vld [vmem:[#allocation11 + $0x6b4] sm:$0xf0]  ;;  %v3703_v18 = vld [vmem:[#allocation11 + $0x820] sm:$0xf] }
 0x254   :  { %2461 = vmatpush.bf16.msra.mxu1 %v3344_v38  ;;  %v4079_v38 = vld [vmem:[#allocation11 + $0x834] sm:$0xf0]  ;;  %v3512_v33 = vor.u32 %v4031_v37, %v3511_v36  ;;  %v4004_v36 = vld [vmem:[#allocation11 + $0x5e4] sm:$0xf]  ;;  %v3417_v37 = vld [vmem:[#allocation11 + $0x5f8] sm:$0xf0] }
 0x255   :  { %2498 = vmatpush.bf16.msrb.mxu3 %v2820_v28  ;;  %v3536_v28 = vor.u32 %v4037_v16, %v3535_v15  ;;  %v3704_v39 = vor.u32 %v4079_v38, %v3703_v18  ;;  %v3464_v16 = vor.u32 %v4019_v8, %v3463_v7 }
 0x256   :  { %2427 = vmatmul.bf16.vlgmr.msra.gmra.mxu0 %v4443_v2  ;;  %2440 = vmatmul.bf16.vlgmr.msra.gmra.mxu2 %v4445_v3 }
 0x257   :  { %2471 = vmatpush.bf16.msrb.mxu0 %v3608_v40  ;;  %2484 = vmatpush.bf16.msrb.mxu2 %v3800_v43  ;;  %v3908_v40 = vld [vmem:[#allocation11 + $0x2e4] sm:$0xf]  ;;  %v2697_v43 = vld [vmem:[#allocation11 + $0x58] sm:$0xf0] }
 0x258   :  { %2462 = vmatpush.bf16.msra.mxu1 %v3320_v54  ;;  %v3036_v46 = vor.u32 %v3908_v40, %v3033_v41  ;;  %v2700_v51 = vor.u32 %v3824_v42, %v2697_v43  ;;  %v3902_v54 = vld [vmem:[#allocation11 + $0x2b4] sm:$0xf]  ;;  %v4040_v40 = vld [vmem:[#allocation11 + $0x704] sm:$0xf]  ;;  %v3561_v41 = vld [vmem:[#allocation11 + $0x718] sm:$0xf0] }
 0x259   :  { %2499 = vmatpush.bf16.msrb.mxu3 %v2796_v44  ;;  %v3248_v44 = vor.u32 %v3965_v30, %v3247_v29  ;;  %v2233_v62 = vpop.f32.mrf.mxu2  ;;  %v3012_v6 = vor.u32 %v3902_v54, %v3009_v55  ;;  %v3890_v29 = vld [vmem:[#allocation11 + $0x254] sm:$0xf]  ;;  %v2961_v30 = vld [vmem:[#allocation11 + $0x268] sm:$0xf0] }
 0x25a   :  { %v2209_v63 = vpop.f32.mrf.mxu1  ;;  %v3998_v54 = vld [vmem:[#allocation11 + $0x5b4] sm:$0xf]  ;;  %v3393_v55 = vld [vmem:[#allocation11 + $0x5c8] sm:$0xf0] }
 0x25b   :  { %2472 = vmatpush.bf16.msrb.mxu0 %v3584_v58  ;;  %2485 = vmatpush.bf16.msrb.mxu2 %v3776_v53  ;;  %v2208_v58 = vadd.f32 %v2207_v26, %v2195_v45  ;;  %v3609_v53 = vld [vmem:[#allocation11 + $0x778] sm:$0xf0]  ;;  %v2248_v4 = vpop.f32.mrf.mxu3  ;;  %v3631_v26 = vld [vmem:[#allocation11 + $0x790] sm:$0xf]  ;;  %v2913_v63 = vld [vmem:[#allocation11 + $0x208] sm:$0xf0] }
 0x25c   :  { %2463 = vmatpush.bf16.msra.mxu1 %v3296_v9  ;;  %v3655_v9 = vld [vmem:[#allocation11 + $0x7c0] sm:$0xf]  ;;  %v3612_v15 = vor.u32 %v4052_v27, %v3609_v53  ;;  %v3177_v53 = vld [vmem:[#allocation11 + $0x418] sm:$0xf0] }
 0x25d   :  { %2500 = vmatpush.bf16.msrb.mxu3 %v2772_v1  ;;  %v2222_v1 = vpop.f32.mrf.mxu0  ;;  %v3656_v23 = vor.u32 %v4067_v11, %v3655_v9  ;;  %v3369_v4 = vld [vmem:[#allocation11 + $0x598] sm:$0xf0]  ;;  %v3872_v11 = vld [vmem:[#allocation11 + $0x1c4] sm:$0xf] }
 0x25e   :  { %v3992_v1 = vld [vmem:[#allocation11 + $0x584] sm:$0xf] }
 0x25f   :  { %2473 = vmatpush.bf16.msrb.mxu0 %v3560_v10  ;;  %2486 = vmatpush.bf16.msrb.mxu2 %v3752_v13  ;;  %v2676_v10 = vor.u32 %v3818_v59, %v2673_v60  ;;  %v2985_v13 = vld [vmem:[#allocation11 + $0x298] sm:$0xf0]  ;;  %v3537_v59 = vld [vmem:[#allocation11 + $0x6e8] sm:$0xf0]  ;;  %v3396_v60 = vor.u32 %v3998_v54, %v3393_v55 }
 0x260   :  { %2464 = vmatpush.bf16.msra.mxu1 %v3272_v25  ;;  %v2988_v24 = vor.u32 %v3896_v12, %v2985_v13  ;;  %v4013_v25 = vld [vmem:[#allocation11 + $0x624] sm:$0xf0]  ;;  %v2889_v12 = vld [vmem:[#allocation11 + $0x1d8] sm:$0xf0]  ;;  %v3938_v13 = vld [vmem:[#allocation11 + $0x3d4] sm:$0xf] }
 0x261   :  { %2501 = vmatpush.bf16.msrb.mxu3 %v2748_v14  ;;  %v2221_v14 = vadd.f32 %v2220_v31, %v2208_v58  ;;  %v3956_v31 = vld [vmem:[#allocation11 + $0x464] sm:$0xf]  ;;  %v2235_v18 = vpop.f32.mrf.mxu2  ;;  %v3440_v38 = vor.u32 %v4013_v25, %v3439_v20  ;;  %v4034_v58 = vld [vmem:[#allocation11 + $0x6d4] sm:$0xf]  ;;  %v3489_v20 = vld [vmem:[#allocation11 + $0x688] sm:$0xf0] }
 0x262   :  { %v3540_v27 = vor.u32 %v4034_v58, %v3537_v59  ;;  %v3801_v18 = vld [vmem:[#allocation11 + $0x8f8] sm:$0xf0] }
 0x263   :  { %2474 = vmatpush.bf16.msrb.mxu0 %v3536_v28  ;;  %2487 = vmatpush.bf16.msrb.mxu2 %v3728_v34  ;;  %v2234_v22 = vadd.f32 %v2233_v62, %v2221_v14  ;;  %v4061_v28 = vld [vmem:[#allocation11 + $0x7a4] sm:$0xf0]  ;;  %v3588_v34 = vor.u32 %v4046_v17, %v3585_v19  ;;  %v3878_v62 = vld [vmem:[#allocation11 + $0x1f4] sm:$0xf]  ;;  %v3345_v17 = vld [vmem:[#allocation11 + $0x568] sm:$0xf0] }
 0x264   :  { %2465 = vmatpush.bf16.msra.mxu1 %v3248_v44  ;;  %v3632_v43 = vor.u32 %v4061_v28, %v3631_v26  ;;  %v2964_v44 = vor.u32 %v3890_v29, %v2961_v30  ;;  %v2916_v7 = vor.u32 %v3878_v62, %v2913_v63  ;;  %v4022_v19 = vld [vmem:[#allocation11 + $0x674] sm:$0xf]  ;;  %v2865_v28 = vld [vmem:[#allocation11 + $0x1a8] sm:$0xf0]  ;;  %v3932_v29 = vld [vmem:[#allocation11 + $0x3a4] sm:$0xf] }
 0x265   :  { %2502 = vmatpush.bf16.msrb.mxu3 %v2724_v35  ;;  %v3225_v35 = vld [vmem:[#allocation11 + $0x478] sm:$0xf0]  ;;  %v2247_v42 = vadd.f32 %v4492_v32, %v2234_v22  ;;  %v2892_v22 = vor.u32 %v3872_v11, %v2889_v12  ;;  %v4082_v11 = vld [vmem:[#allocation11 + $0x854] sm:$0xf]  ;;  %v3729_v12 = vld [vmem:[#allocation11 + $0x868] sm:$0xf0] }
 0x266   :  { %v3228_v45 = vor.u32 %v3956_v31, %v3225_v35  ;;  %v3129_v30 = vld [vmem:[#allocation11 + $0x3b8] sm:$0xf0]  ;;  %v3980_v35 = vld [vmem:[#allocation11 + $0x524] sm:$0xf] }
 0x267   :  { %2475 = vmatpush.bf16.msrb.mxu0 %v3512_v33  ;;  %2488 = vmatpush.bf16.msrb.mxu2 %v3704_v39  ;;  %v2259_v33 = vpop.f32.mrf.mxu1  ;;  %v3420_v39 = vor.u32 %v4004_v36, %v3417_v37  ;;  %v3321_v36 = vld [vmem:[#allocation11 + $0x538] sm:$0xf0]  ;;  %v4100_v37 = vld [vmem:[#allocation11 + $0x8e4] sm:$0xf] }
 0x268   :  { %2510 = vmatpush.bf16.msrb.mxu1 %v3036_v46  ;;  %v3884_v46 = vld [vmem:[#allocation11 + $0x224] sm:$0xf]  ;;  %v2260_v50 = vadd.f32 %v2259_v33, %v2247_v42  ;;  %v3132_v42 = vor.u32 %v3932_v29, %v3129_v30  ;;  %v3105_v33 = vld [vmem:[#allocation11 + $0x388] sm:$0xf0]  ;;  %v3081_v63 = vld [vmem:[#allocation11 + $0x358] sm:$0xf0] }
 0x269   :  { %2503 = vmatpush.bf16.msrb.mxu3 %v2700_v51  ;;  %2466 = vmatmul.bf16.vlgmr.msra.gmra.mxu1 %v4454_v56  ;;  %v3564_v51 = vor.u32 %v4040_v40, %v3561_v41  ;;  %v2940_v32 = vor.u32 %v3884_v46, %v2937_v48  ;;  %v3465_v40 = vld [vmem:[#allocation11 + $0x658] sm:$0xf0]  ;;  %v3974_v46 = vld [vmem:[#allocation11 + $0x4f4] sm:$0xf]  ;;  %v3297_v48 = vld [vmem:[#allocation11 + $0x508] sm:$0xf0] }
 0x26a   :  { %2576 = vst [vmem:[#allocation14 + $0x8] sm:$0xff] %v2260_v50  ;;  %v3777_v50 = vld [vmem:[#allocation11 + $0x8c8] sm:$0xf0]  ;;  %v3300_v59 = vor.u32 %v3974_v46, %v3297_v48  ;;  %v4064_v29 = vld [vmem:[#allocation11 + $0x7c4] sm:$0xf] }
 0x26b   :  { %2476 = vmatpush.bf16.msrb.mxu0 %v3488_v0  ;;  %2489 = vmatpush.bf16.msrb.mxu2 %v3680_v5  ;;  %v3944_v0 = vld [vmem:[#allocation11 + $0x404] sm:$0xf]  ;;  %v3657_v30 = vld [vmem:[#allocation11 + $0x7d8] sm:$0xf0] }
 0x26c   :  { %2511 = vmatpush.bf16.msrb.mxu1 %v3012_v6  ;;  %v4028_v5 = vld [vmem:[#allocation11 + $0x6a4] sm:$0xf]  ;;  %v3513_v6 = vld [vmem:[#allocation11 + $0x6b8] sm:$0xf0]  ;;  %v3180_v9 = vor.u32 %v3944_v0, %v3177_v53 }
 0x26d   :  { %2504 = vmatpush.bf16.msrb.mxu3 %v2676_v10  ;;  %v3372_v10 = vor.u32 %v3992_v1, %v3369_v4  ;;  %v3516_v14 = vor.u32 %v4028_v5, %v3513_v6  ;;  %v3968_v0 = vld [vmem:[#allocation11 + $0x4c4] sm:$0xf]  ;;  %v3753_v1 = vld [vmem:[#allocation11 + $0x898] sm:$0xf0]  ;;  %v3914_v6 = vld [vmem:[#allocation11 + $0x314] sm:$0xf] }
 0x26e   :  { %v4088_v53 = vld [vmem:[#allocation11 + $0x884] sm:$0xf] }
 0x26f   :  { %2477 = vmatpush.bf16.msrb.mxu0 %v3464_v16  ;;  %2490 = vmatpush.bf16.msrb.mxu2 %v3656_v23  ;;  %v2261_v8 = vpop.f32.mrf.mxu1  ;;  %v3986_v16 = vld [vmem:[#allocation11 + $0x554] sm:$0xf] }
 0x270   :  { %2512 = vmatpush.bf16.msrb.mxu1 %v2988_v24  ;;  %2505 = vmatmul.bf16.vlgmr.msrb.gmra.mxu3 %v4443_v2  ;;  %v3204_v2 = vor.u32 %v3950_v49, %v3201_v52  ;;  %v3866_v23 = vld [vmem:[#allocation11 + $0x194] sm:$0xf]  ;;  %v3348_v26 = vor.u32 %v3986_v16, %v3345_v17  ;;  %v3441_v52 = vld [vmem:[#allocation11 + $0x628] sm:$0xf0]  ;;  %v3732_v16 = vor.u32 %v4082_v11, %v3729_v12  ;;  %v4076_v17 = vld [vmem:[#allocation11 + $0x824] sm:$0xf] }
 0x271   :  { %2549 = vmatpush.bf16.msra.mxu3 %v3612_v15  ;;  %v3153_v15 = vld [vmem:[#allocation11 + $0x3e8] sm:$0xf0]  ;;  %v2868_v41 = vor.u32 %v3866_v23, %v2865_v28  ;;  %v4094_v49 = vld [vmem:[#allocation11 + $0x8b4] sm:$0xf] }
 0x272   :  { %v3156_v25 = vor.u32 %v3938_v13, %v3153_v15  ;;  %v3057_v8 = vld [vmem:[#allocation11 + $0x328] sm:$0xf0]  ;;  %v4070_v23 = vld [vmem:[#allocation11 + $0x7f4] sm:$0xf] }
 0x273   :  { %2478 = vmatpush.bf16.msrb.mxu0 %v3440_v38  ;;  %2491 = vmatpush.bf16.msrb.mxu2 %v3632_v43  ;;  %v4500_v24 = vpop.f32.mrf.mxu0  ;;  %v4502_v31 = vpop.f32.mrf.mxu3  ;;  %v4016_v38 = vld [vmem:[#allocation11 + $0x644] sm:$0xf]  ;;  %v3324_v43 = vor.u32 %v3980_v35, %v3321_v36  ;;  %v3660_v35 = vor.u32 %v4064_v29, %v3657_v30 }
 0x274   :  { %2513 = vmatpush.bf16.msrb.mxu1 %v2964_v44  ;;  %v3926_v44 = vld [vmem:[#allocation11 + $0x374] sm:$0xf] }
 0x275   :  { %2550 = vmatpush.bf16.msra.mxu3 %v3588_v34  ;;  %v3492_v34 = vor.u32 %v4022_v19, %v3489_v20  ;;  %v3108_v58 = vor.u32 %v3926_v44, %v3105_v33  ;;  %v3705_v19 = vld [vmem:[#allocation11 + $0x838] sm:$0xf0]  ;;  %v657_v20 = vperm.slane %v4481_v21, 2 }
 0x276   :  { %2479 = vmatmul.bf16.vlgmr.msrb.gmra.mxu0 %v4456_v57  ;;  %2492 = vmatmul.bf16.vlgmr.msrb.gmra.mxu2 %v4458_v61 }
 0x277   :  { %2523 = vmatpush.bf16.msra.mxu0 %v3228_v45  ;;  %2536 = vmatpush.bf16.msra.mxu2 %v3420_v39  ;;  %v3804_v45 = vor.u32 %v4100_v37, %v3801_v18  ;;  %v3468_v39 = vor.u32 %v4016_v38, %v3465_v40  ;;  %v4058_v18 = vld [vmem:[#allocation11 + $0x794] sm:$0xf]  ;;  %v3633_v38 = vld [vmem:[#allocation11 + $0x7a8] sm:$0xf0] }
 0x278   :  { %2514 = vmatpush.bf16.msrb.mxu1 %v2940_v32  ;;  %v3920_v32 = vld [vmem:[#allocation11 + $0x344] sm:$0xf] }
 0x279   :  { %2551 = vmatpush.bf16.msra.mxu3 %v3564_v51  ;;  %v4010_v51 = vld [vmem:[#allocation11 + $0x614] sm:$0xf]  ;;  %v2285_v54 = vpop.f32.mrf.mxu2  ;;  %v3084_v4 = vor.u32 %v3920_v32, %v3081_v63 }
 0x27a   :  { %v3444_v62 = vor.u32 %v4010_v51, %v3441_v52 }
 0x27b   :  { %2524 = vmatpush.bf16.msra.mxu0 %v3204_v2  ;;  %2537 = vmatpush.bf16.msra.mxu2 %v3396_v60  ;;  %v2274_v55 = vpop.f32.mrf.mxu0  ;;  %v2300_v2 = vpop.f32.mrf.mxu3  ;;  %v3780_v60 = vor.u32 %v4094_v49, %v3777_v50  ;;  %v658_v49 = vperm.slane %v4481_v21, 3 }
 0x27c   :  { %2515 = vmatpush.bf16.msrb.mxu1 %v2916_v7  ;;  %v3756_v7 = vor.u32 %v4088_v53, %v3753_v1 }
 0x27d   :  { %2552 = vmatpush.bf16.msra.mxu3 %v3540_v27  ;;  %v3273_v27 = vld [vmem:[#allocation11 + $0x4d8] sm:$0xf0] }
 0x27e   :  { %v3276_v5 = vor.u32 %v3968_v0, %v3273_v27 }
 0x27f   :  { %2525 = vmatpush.bf16.msra.mxu0 %v3180_v9  ;;  %2538 = vmatpush.bf16.msra.mxu2 %v3372_v10  ;;  %v3962_v9 = vld [vmem:[#allocation11 + $0x494] sm:$0xf]  ;;  %v3249_v10 = vld [vmem:[#allocation11 + $0x4a8] sm:$0xf0] }
 0x280   :  { %2516 = vmatpush.bf16.msrb.mxu1 %v2892_v22  ;;  %v3708_v22 = vor.u32 %v4076_v17, %v3705_v19 }
 0x281   :  { %2553 = vmatpush.bf16.msra.mxu3 %v3516_v14  ;;  %v2287_v13 = vpop.f32.mrf.mxu2  ;;  %v3060_v14 = vor.u32 %v3914_v6, %v3057_v8 }
 0x283   :  { %2526 = vmatpush.bf16.msra.mxu0 %v3156_v25  ;;  %2539 = vmatpush.bf16.msra.mxu2 %v3348_v26  ;;  %v3681_v25 = vld [vmem:[#allocation11 + $0x808] sm:$0xf0]  ;;  %v2273_v26 = vadd.f32 %v4500_v24, %v657_v20 }
 0x284   :  { %2517 = vmatpush.bf16.msrb.mxu1 %v2868_v41  ;;  %v3684_v28 = vor.u32 %v4070_v23, %v3681_v25  ;;  %v660_v25 = vperm.slane %v4481_v21, 5 }
 0x285   :  { %2554 = vmatpush.bf16.msra.mxu3 %v3492_v34  ;;  %v2286_v34 = vadd.f32 %v2285_v54, %v2273_v26 }
 0x286   :  { %v2311_v15 = vpop.f32.mrf.mxu1 }
 0x287   :  { %2527 = vmatpush.bf16.msra.mxu0 %v3132_v42  ;;  %2540 = vmatpush.bf16.msra.mxu2 %v3324_v43  ;;  %v2299_v40 = vadd.f32 %v4502_v31, %v2286_v34 }
 0x288   :  { %2562 = vmatpush.bf16.msra.mxu1 %v3804_v45 }
 0x289   :  { %2555 = vmatpush.bf16.msra.mxu3 %v3468_v39  ;;  %2518 = vmatmul.bf16.vlgmr.msrb.gmra.mxu1 %v4445_v3  ;;  %v3252_v3 = vor.u32 %v3962_v9, %v3249_v10  ;;  %v2312_v41 = vadd.f32 %v2311_v15, %v2299_v40 }
 0x28b   :  { %2528 = vmatpush.bf16.msra.mxu0 %v3108_v58  ;;  %2541 = vmatpush.bf16.msra.mxu2 %v3300_v59 }
 0x28c   :  { %2563 = vmatpush.bf16.msra.mxu1 %v3780_v60 }
 0x28d   :  { %2556 = vmatpush.bf16.msra.mxu3 %v3444_v62 }
 0x28f   :  { %2529 = vmatpush.bf16.msra.mxu0 %v3084_v4  ;;  %2542 = vmatpush.bf16.msra.mxu2 %v3276_v5  ;;  %v659_v5 = vperm.slane %v4481_v21, 4 }
 0x290   :  { %2564 = vmatpush.bf16.msra.mxu1 %v3756_v7  ;;  %2557 = vmatmul.bf16.vlgmr.msra.gmra.mxu3 %v4456_v57  ;;  %v2313_v57 = vpop.f32.mrf.mxu1 }
 0x293   :  { %2530 = vmatpush.bf16.msra.mxu0 %v3060_v14  ;;  %2543 = vmatpush.bf16.msra.mxu2 %v3252_v3  ;;  %v2324_v36 = vpop.f32.mrf.mxu0  ;;  %v2350_v37 = vpop.f32.mrf.mxu3 }
 0x294   :  { %2565 = vmatpush.bf16.msra.mxu1 %v3732_v16  ;;  %v2351_v31 = vadd.f32 %v2350_v37, %v658_v49 }
 0x296   :  { %2531 = vmatmul.bf16.vlgmr.msra.gmra.mxu0 %v4440_v47  ;;  %2544 = vmatmul.bf16.vlgmr.msra.gmra.mxu2 %v4454_v56  ;;  %v3636_v47 = vor.u32 %v4058_v18, %v3633_v38  ;;  %v2325_v56 = vadd.f32 %v2324_v36, %v2312_v41 }
 0x298   :  { %2566 = vmatpush.bf16.msra.mxu1 %v3708_v22 }
 0x299   :  { %v2337_v42 = vpop.f32.mrf.mxu2 }
 0x29a   :  { %v2338_v24 = vadd.f32 %v2337_v42, %v2325_v56 }
 0x29b   :  { %v2326_v43 = vpop.f32.mrf.mxu0  ;;  %v2352_v44 = vpop.f32.mrf.mxu3 }
 0x29c   :  { %2567 = vmatpush.bf16.msra.mxu1 %v3684_v28  ;;  %2577 = vst [vmem:[#allocation14 + $0x10] sm:$0xff] %v2338_v24 }
 0x2a0   :  { %2568 = vmatpush.bf16.msra.mxu1 %v3660_v35 }
 0x2a1   :  { %v2339_v33 = vpop.f32.mrf.mxu2 }
 0x2a4   :  { %2569 = vmatpush.bf16.msra.mxu1 %v3636_v47 }
 0x2a6   :  { %v2363_v45 = vpop.f32.mrf.mxu1 }
 0x2a7   :  { %2570 = vmatmul.bf16.vlgmr.msra.gmra.mxu1 %v4458_v61  ;;  %v2364_v51 = vadd.f32 %v2363_v45, %v2351_v31 }
 0x2ae   :  { %v2365_v39 = vpop.f32.mrf.mxu1 }
 0x2b3   :  { %v2376_v46 = vpop.f32.mrf.mxu0  ;;  %v2402_v48 = vpop.f32.mrf.mxu3 }
 0x2b4   :  { %v2377_v55 = vadd.f32 %v2376_v46, %v2364_v51 }
 0x2b9   :  { %v2389_v50 = vpop.f32.mrf.mxu2 }
 0x2ba   :  { %v2390_v58 = vadd.f32 %v2389_v50, %v2377_v55 }
 0x2bb   :  { %v2378_v52 = vpop.f32.mrf.mxu0  ;;  %v2404_v54 = vpop.f32.mrf.mxu3 }
 0x2bc   :  { %v2403_v32 = vadd.f32 %v2402_v48, %v2390_v58 }
 0x2c1   :  { %v2391_v59 = vpop.f32.mrf.mxu2 }
 0x2c6   :  { %v2415_v2 = vpop.f32.mrf.mxu1 }
 0x2c7   :  { %v2416_v60 = vadd.f32 %v2415_v2, %v2403_v32 }
 0x2c9   :  { %2578 = vst [vmem:[#allocation14 + $0x18] sm:$0xff] %v2416_v60 }
 0x2ce   :  { %v2417_v61 = vpop.f32.mrf.mxu1 }
 0x2d3   :  { %v2428_v62 = vpop.f32.mrf.mxu0  ;;  %v2454_v63 = vpop.f32.mrf.mxu3 }
 0x2d4   :  { %v2429_v6 = vadd.f32 %v2428_v62, %v659_v5 }
 0x2d9   :  { %v2441_v0 = vpop.f32.mrf.mxu2 }
 0x2da   :  { %v2442_v8 = vadd.f32 %v2441_v0, %v2429_v6 }
 0x2db   :  { %v2430_v27 = vpop.f32.mrf.mxu0  ;;  %v2456_v53 = vpop.f32.mrf.mxu3 }
 0x2dc   :  { %v2455_v11 = vadd.f32 %v2454_v63, %v2442_v8 }
 0x2e1   :  { %v2443_v1 = vpop.f32.mrf.mxu2 }
 0x2e6   :  { %v2467_v4 = vpop.f32.mrf.mxu1 }
 0x2e7   :  { %v2468_v12 = vadd.f32 %v2467_v4, %v2455_v11 }
 0x2ee   :  { %v2469_v7 = vpop.f32.mrf.mxu1 }
 0x2f3   :  { %v2480_v9 = vpop.f32.mrf.mxu0  ;;  %v2506_v10 = vpop.f32.mrf.mxu3 }
 0x2f4   :  { %v2481_v13 = vadd.f32 %v2480_v9, %v2468_v12  ;;  %v2507_v26 = vadd.f32 %v2506_v10, %v660_v25 }
 0x2f9   :  { %v2493_v14 = vpop.f32.mrf.mxu2 }
 0x2fa   :  { %v2494_v3 = vadd.f32 %v2493_v14, %v2481_v13 }
 0x2fb   :  { %v2482_v15 = vpop.f32.mrf.mxu0  ;;  %v2508_v16 = vpop.f32.mrf.mxu3 }
 0x2fc   :  { %2579 = vst [vmem:[#allocation14 + $0x20] sm:$0xff] %v2494_v3 }
 0x301   :  { %v2495_v17 = vpop.f32.mrf.mxu2 }
 0x306   :  { %v2519_v19 = vpop.f32.mrf.mxu1 }
 0x307   :  { %v2520_v28 = vadd.f32 %v2519_v19, %v2507_v26 }
 0x30e   :  { %v2521_v20 = vpop.f32.mrf.mxu1 }
 0x313   :  { %v2532_v22 = vpop.f32.mrf.mxu0  ;;  %v2558_v23 = vpop.f32.mrf.mxu3 }
 0x314   :  { %v2533_v34 = vadd.f32 %v2532_v22, %v2520_v28 }
 0x319   :  { %v2545_v57 = vpop.f32.mrf.mxu2 }
 0x31a   :  { %v2546_v35 = vadd.f32 %v2545_v57, %v2533_v34 }
 0x31b   :  { %v2534_v29 = vpop.f32.mrf.mxu0  ;;  %v2560_v30 = vpop.f32.mrf.mxu3 }
 0x31c   :  { %v2559_v37 = vadd.f32 %v2558_v23, %v2546_v35 }
 0x321   :  { %v2547_v36 = vpop.f32.mrf.mxu2 }
 0x324   :  { %v2571_v18 = vpop.f32.mrf.mxu1 }
 0x325   :  { %v2572_v38 = vadd.f32 %v2571_v18, %v2559_v37 }
 0x327   :  { %2580 = vst [vmem:[#allocation14 + $0x28] sm:$0xff] %v2572_v38 }
 0x328   :  { %2591 = dma.vmem_to_hbm [thread:$0]  %s2587_s3, 768, %s2589_s30, [#allocation4]  }
 0x32c   :  { %v2573_v21 = vpop.f32.mrf.mxu1 }
 0x32d   :  { %4318 = dma.done.wait [#allocation4], 768  }
 0x32e   :  { %4319 = vsyncadd [#allocation4], 4294966528 }
 0x32f   :  { %2596 = vsyncpa [#allocation3], 1 }
 0x330   :  { %2597 = vsyncpa [#allocation6], 1 }
 0x331   :  { %2598 = vsyncpa [#allocation9], 1 }
 0x332   :  { %2599 = vsyncpa [#allocation12], 1 }
 0x333   :  { %2600 = vsyncpa [#allocation4], 1 }

</bundles_post_ra>
